<compile_context>
chip_gen: v7x
topology: tpu7x:2x2x1
jax: 0.10.0
libtpu: 0.0.40
codegen_flags: <defaults>
</compile_context>

<pallas_src>
import jax
import jax.numpy as jnp
from jax.experimental import pallas as pl
from jax.experimental.pallas import tpu as pltpu

# ----------------------------- configuration --------------------------------
DILATIONS = (1, 2, 4)                     # D2Block default dilation=[1, 2, 4]
N_LAYERS = len(DILATIONS)                 # number of MDConv2d layers
N_CONVS = N_LAYERS * (N_LAYERS + 1) // 2  # total BN->ReLU->Conv branches (=6)
BN_EPS = 1e-5


# ----------------------------- fused Pallas kernel ---------------------------
def _make_d2block_kernel(H, W, Cd):
    HW = H * W

    def kernel(x_ref, pw_ref, b_ref, s_ref, t_ref, w0_ref, w1_ref, w2_ref,
               o_ref, acts_ref):
        w_refs = (w0_ref, w1_ref, w2_ref)

        # Hoisted lane-index helpers for the 'same'-padding border masks.
        lane = jax.lax.broadcasted_iota(jnp.int32, (Cd, HW), 1)   # flat h*W+w
        col = lane % W                                            # w index

        def shifted_tap(act, dh, dw):
            """tap[c, h*W+w] = act[c, (h+dh)*W + (w+dw)], zero outside the image."""
            off = dh * W + dw
            # lane rotate (XLU); wrapped positions are zeroed by the mask below
            tap = act if off == 0 else pltpu.roll(act, (-off) % HW, axis=1)
            conds = []
            if dh > 0:
                conds.append(lane < (H - dh) * W)
            elif dh < 0:
                conds.append(lane >= (-dh) * W)
            if dw > 0:
                conds.append(col < W - dw)
            elif dw < 0:
                conds.append(col >= -dw)
            if conds:
                m = conds[0]
                for extra in conds[1:]:
                    m = jnp.logical_and(m, extra)
                tap = jnp.where(m, tap, 0.0)
            return tap

        # 1x1 projection: one MXU matmul; result already (Cd, HW) lane-dense.
        y0 = jnp.dot(pw_ref[...], x_ref[0],
                     preferred_element_type=jnp.float32) + b_ref[0:Cd, :]
        o_ref[0, 0] = y0
        outs = [y0]                                   # (Cd, HW), stay on-chip

        idx = 0                                       # flat (layer, branch) index
        for i in range(N_LAYERS):                     # MDConv2d layer i
            row = 0
            for j in range(i + 1):                    # branch j: BN->ReLU->conv(d_j)
                d = DILATIONS[j]
                # eval-mode BatchNorm folded to scale/shift, fused with ReLU
                act = jnp.maximum(
                    outs[j] * s_ref[idx * Cd:(idx + 1) * Cd, :]
                    + t_ref[idx * Cd:(idx + 1) * Cd, :], 0.0)
                # stack the nine shifted taps on the sublane axis of the slab
                for kh in range(3):
                    for kw in range(3):
                        acts_ref[row:row + Cd, :] = shifted_tap(
                            act, (kh - 1) * d, (kw - 1) * d)
                        row += Cd
                idx += 1
            # ONE MXU matmul for the whole layer: (Cd, K) @ (K, HW), K=(i+1)*9*Cd
            yi = jnp.dot(w_refs[i][...], acts_ref[0:row, :],
                         preferred_element_type=jnp.float32) \
                 + b_ref[(i + 1) * Cd:(i + 2) * Cd, :]
            o_ref[0, i + 1] = yi
            outs.append(yi)

    return kernel


# ----------------------------- JAX wrapper ------------------------------------
def d2block_forward(params, x):
    """D2Block.forward (eval mode).  x: (B, in_dim, H, W) -> (B, 4*conv_dim, H, W)."""
    Bb, Cin, H, W = x.shape
    Cd = params["proj_b"].shape[0]
    HW = H * W
    n_out = N_LAYERS + 1
    assert HW % 128 == 0, "lane-dense layout assumes H*W is a multiple of 128"

    # --- fold eval-mode BN into scale/shift; pack per-layer K-concatenated,
    # --- transposed conv weights (Cd, (i+1)*9*Cd); biases as column vectors ---
    s_rows, t_rows, w_layers, b_rows = [], [], [], [params["proj_b"]]
    for i in range(N_LAYERS):
        wk = []
        bsum = jnp.zeros((Cd,), jnp.float32)
        for j in range(i + 1):
            c = params["convs"][i][j]
            sc = c["gamma"] * jax.lax.rsqrt(c["var"] + BN_EPS)
            s_rows.append(sc)
            t_rows.append(c["beta"] - c["mean"] * sc)
            wk.append(c["w"].reshape(9 * Cd, Cd))       # [(kh*3+kw)*Cd + cin, cout]
            bsum = bsum + c["b"]
        w_layers.append(jnp.concatenate(wk, axis=0).T)  # (Cd, (i+1)*9*Cd)
        b_rows.append(bsum)
    s_col = jnp.concatenate(s_rows).reshape(N_CONVS * Cd, 1)
    t_col = jnp.concatenate(t_rows).reshape(N_CONVS * Cd, 1)
    b_col = jnp.concatenate(b_rows).reshape(n_out * Cd, 1)
    pw_t = params["proj_w"].T                            # (Cd, Cin)

    # NCHW -> (B, Cin, HW): a pure reshape, channels on sublanes / HW on lanes.
    x_flat = x.reshape(Bb, Cin, HW)

    out = pl.pallas_call(
        _make_d2block_kernel(H, W, Cd),
        out_shape=jax.ShapeDtypeStruct((Bb, n_out, Cd, HW), jnp.float32),
        grid=(Bb,),
        in_specs=[
            pl.BlockSpec((1, Cin, HW), lambda b: (b, 0, 0)),
            pl.BlockSpec((Cd, Cin), lambda b: (0, 0)),
            pl.BlockSpec((n_out * Cd, 1), lambda b: (0, 0)),
            pl.BlockSpec((N_CONVS * Cd, 1), lambda b: (0, 0)),
            pl.BlockSpec((N_CONVS * Cd, 1), lambda b: (0, 0)),
            pl.BlockSpec((Cd, 1 * 9 * Cd), lambda b: (0, 0)),
            pl.BlockSpec((Cd, 2 * 9 * Cd), lambda b: (0, 0)),
            pl.BlockSpec((Cd, 3 * 9 * Cd), lambda b: (0, 0)),
        ],
        out_specs=pl.BlockSpec((1, n_out, Cd, HW), lambda b: (b, 0, 0, 0)),
        scratch_shapes=[
            pltpu.VMEM((N_LAYERS * 9 * Cd, HW), jnp.float32),   # stacked taps
        ],
        compiler_params=pltpu.CompilerParams(
            dimension_semantics=("parallel",),
        ),
    )(x_flat, pw_t, b_col, s_col, t_col,
      w_layers[0], w_layers[1], w_layers[2])

    # Channels already ordered [out0 | out1 | out2 | out3]; pure reshape out,
    # matching torch.cat(..., dim=1) in NCHW.
    return out.reshape(Bb, n_out * Cd, H, W)


# ----------------------------- pure-JAX reference -----------------------------
def d2block_reference(params, x):
    """Pure XLA reference (eval-mode BN), NCHW in / NCHW out."""
    xh = jnp.transpose(x, (0, 2, 3, 1))                               # NHWC
    y0 = jnp.einsum("bhwc,cd->bhwd", xh, params["proj_w"],
                    precision=jax.lax.Precision.HIGHEST) + params["proj_b"]
    outs = [y0]
    for i in range(N_LAYERS):
        acc = None
        for j in range(i + 1):
            c = params["convs"][i][j]
            a = (outs[j] - c["mean"]) * jax.lax.rsqrt(c["var"] + BN_EPS) \
                * c["gamma"] + c["beta"]
            a = jnp.maximum(a, 0.0)
            d = DILATIONS[j]
            y = jax.lax.conv_general_dilated(
                a, c["w"], window_strides=(1, 1),
                padding=[(d, d), (d, d)], rhs_dilation=(d, d),
                dimension_numbers=("NHWC", "HWIO", "NHWC"),
                precision=jax.lax.Precision.HIGHEST) + c["b"]
            acc = y if acc is None else acc + y
        outs.append(acc)
    out = jnp.concatenate(outs, axis=-1)
    return jnp.transpose(out, (0, 3, 1, 2))


# ----------------------------- parameters -------------------------------------
def init_params(key, in_dim, conv_dim):
    keys = iter(jax.random.split(key, 64))

    def nrm(shape, scale):
        return scale * jax.random.normal(next(keys), shape, jnp.float32)

    params = {
        "proj_w": nrm((in_dim, conv_dim), (2.0 / in_dim) ** 0.5),
        "proj_b": nrm((conv_dim,), 0.1),
        "convs": [],
    }
    for i in range(N_LAYERS):
        branch = []
        for _ in range(i + 1):
            branch.append(dict(
                w=nrm((3, 3, conv_dim, conv_dim), (2.0 / (9 * conv_dim)) ** 0.5),
                b=nrm((conv_dim,), 0.1),
                gamma=1.0 + nrm((conv_dim,), 0.1),
                beta=nrm((conv_dim,), 0.1),
                mean=nrm((conv_dim,), 0.2),
                var=0.5 + jax.random.uniform(next(keys), (conv_dim,), jnp.float32),
            ))
        params["convs"].append(branch)
    return params


# ----------------------------- main --------------------------------------------
if __name__ == "__main__":
    B, IN_DIM, CONV_DIM, H, W = 2, 32, 8, 16, 16

    key = jax.random.PRNGKey(0)
    pkey, xkey = jax.random.split(key)
    params = init_params(pkey, IN_DIM, CONV_DIM)
    x = jax.random.normal(xkey, (B, IN_DIM, H, W), jnp.float32)

    out = jax.block_until_ready(jax.jit(d2block_forward)(params, x))
    assert out.shape == (B, (N_LAYERS + 1) * CONV_DIM, H, W)
    assert bool(jnp.isfinite(out).all())

    ref = jax.block_until_ready(jax.jit(d2block_reference)(params, x))
    rel_err = float(jnp.linalg.norm(out - ref) / (jnp.linalg.norm(ref) + 1e-12))
    assert rel_err < 2e-2, f"mismatch vs reference: rel_err={rel_err}"

    print("KERNEL_OK")
</pallas_src>

<mosaic_0001>
module attributes {stable_mosaic.version = 11 : i64} {
  func.func @kernel(%arg0: i32, %arg1: memref<1x32x256xf32, #tpu.memory_space<vmem>>, %arg2: memref<8x32xf32, #tpu.memory_space<vmem>>, %arg3: memref<32x1xf32, #tpu.memory_space<vmem>>, %arg4: memref<48x1xf32, #tpu.memory_space<vmem>>, %arg5: memref<48x1xf32, #tpu.memory_space<vmem>>, %arg6: memref<8x72xf32, #tpu.memory_space<vmem>>, %arg7: memref<8x144xf32, #tpu.memory_space<vmem>>, %arg8: memref<8x216xf32, #tpu.memory_space<vmem>>, %arg9: memref<1x4x8x256xf32, #tpu.memory_space<vmem>>, %arg10: memref<216x256xf32, #tpu.memory_space<vmem>>) attributes {dimension_semantics = [#tpu.dimension_semantics<parallel>], iteration_bounds = array<i64: 2>, scalar_prefetch = 0 : i64, scratch_operands = 1 : i64, tpu.core_type = #tpu.core_type<tc>, window_params = [{transform_indices = @transform_0, window_bounds = array<i64: 1, 32, 256>}, {pipeline_mode = #tpu.pipeline_mode<synchronous>, transform_indices = @transform_1, window_bounds = array<i64: 8, 32>}, {pipeline_mode = #tpu.pipeline_mode<synchronous>, transform_indices = @transform_2, window_bounds = array<i64: 32, 1>}, {pipeline_mode = #tpu.pipeline_mode<synchronous>, transform_indices = @transform_3, window_bounds = array<i64: 48, 1>}, {pipeline_mode = #tpu.pipeline_mode<synchronous>, transform_indices = @transform_4, window_bounds = array<i64: 48, 1>}, {pipeline_mode = #tpu.pipeline_mode<synchronous>, transform_indices = @transform_5, window_bounds = array<i64: 8, 72>}, {pipeline_mode = #tpu.pipeline_mode<synchronous>, transform_indices = @transform_6, window_bounds = array<i64: 8, 144>}, {pipeline_mode = #tpu.pipeline_mode<synchronous>, transform_indices = @transform_7, window_bounds = array<i64: 8, 216>}, {transform_indices = @transform_8, window_bounds = array<i64: 1, 4, 8, 256>}]} {
    %0 = tpu.iota {dimensions = array<i32: 1>} : vector<8x256xi32>
    %c16_i32 = arith.constant 16 : i32
    %c0_i32 = arith.constant 0 : i32
    %1 = arith.cmpi eq, %c16_i32, %c0_i32 : i32
    %c1_i32 = arith.constant 1 : i32
    %2 = arith.select %1, %c1_i32, %c16_i32 : i32
    %3 = vector.broadcast %2 : i32 to vector<8x256xi32>
    %4 = arith.remsi %0, %3 : vector<8x256xi32>
    %c0_i32_0 = arith.constant 0 : i32
    %5 = vector.broadcast %c0_i32_0 : i32 to vector<8x256xi32>
    %6 = arith.cmpi ne, %4, %5 : vector<8x256xi32>
    %c0_i32_1 = arith.constant 0 : i32
    %7 = vector.broadcast %c0_i32_1 : i32 to vector<8x256xi32>
    %8 = arith.cmpi slt, %4, %7 : vector<8x256xi32>
    %c0_i32_2 = arith.constant 0 : i32
    %9 = arith.cmpi slt, %2, %c0_i32_2 : i32
    %10 = vector.broadcast %9 : i1 to vector<8x256xi1>
    %11 = vector.broadcast %10 : vector<8x256xi1> to vector<8x256xi1>
    %12 = arith.xori %8, %11 : vector<8x256xi1>
    %13 = arith.andi %12, %6 : vector<8x256xi1>
    %14 = vector.broadcast %2 : i32 to vector<8x256xi32>
    %15 = arith.addi %4, %14 : vector<8x256xi32>
    %16 = arith.select %13, %15, %4 : vector<8x256xi1>, vector<8x256xi32>
    %c0 = arith.constant 0 : index
    %c0_3 = arith.constant 0 : index
    %17 = vector.load %arg2[%c0, %c0_3] : memref<8x32xf32, #tpu.memory_space<vmem>>, vector<8x32xf32>
    %c0_4 = arith.constant 0 : index
    %c0_5 = arith.constant 0 : index
    %c0_6 = arith.constant 0 : index
    %18 = vector.load %arg1[%c0_4, %c0_5, %c0_6] : memref<1x32x256xf32, #tpu.memory_space<vmem>>, vector<1x32x256xf32>
    %19 = vector.shape_cast %18 : vector<1x32x256xf32> to vector<32x256xf32>
    %cst = arith.constant dense<0.000000e+00> : vector<8x256xf32>
    %20 = tpu.matmul %17, %19, %cst {dimension_numbers = #tpu.dot_dimension_numbers<[1], [0], [0], [1], [0, 0, 1, 1], [], []>} : vector<8x32xf32>, vector<32x256xf32>, vector<8x256xf32> -> vector<8x256xf32>
    %c0_7 = arith.constant 0 : index
    %c0_8 = arith.constant 0 : index
    %21 = vector.load %arg3[%c0_7, %c0_8] : memref<32x1xf32, #tpu.memory_space<vmem>>, vector<8x1xf32>
    %22 = vector.broadcast %21 : vector<8x1xf32> to vector<8x256xf32>
    %23 = arith.addf %20, %22 : vector<8x256xf32>
    %c0_9 = arith.constant 0 : index
    %c0_10 = arith.constant 0 : index
    %c0_11 = arith.constant 0 : index
    %c0_12 = arith.constant 0 : index
    %24 = vector.load %arg9[%c0_9, %c0_10, %c0_11, %c0_12] : memref<1x4x8x256xf32, #tpu.memory_space<vmem>>, vector<1x1x8x256xf32>
    %25 = vector.shape_cast %24 : vector<1x1x8x256xf32> to vector<8x256xf32>
    %26 = vector.shape_cast %23 : vector<8x256xf32> to vector<1x1x8x256xf32>
    tpu.vector_store %arg9[%c0_9, %c0_10, %c0_11, %c0_12], %26 {strides = array<i32>} : memref<1x4x8x256xf32, #tpu.memory_space<vmem>>, vector<1x1x8x256xf32>,
    %c0_13 = arith.constant 0 : index
    %c0_14 = arith.constant 0 : index
    %27 = vector.load %arg4[%c0_13, %c0_14] : memref<48x1xf32, #tpu.memory_space<vmem>>, vector<8x1xf32>
    %28 = vector.broadcast %27 : vector<8x1xf32> to vector<8x256xf32>
    %29 = arith.mulf %23, %28 : vector<8x256xf32>
    %c0_15 = arith.constant 0 : index
    %c0_16 = arith.constant 0 : index
    %30 = vector.load %arg5[%c0_15, %c0_16] : memref<48x1xf32, #tpu.memory_space<vmem>>, vector<8x1xf32>
    %31 = vector.broadcast %30 : vector<8x1xf32> to vector<8x256xf32>
    %32 = arith.addf %29, %31 : vector<8x256xf32>
    %cst_17 = arith.constant 0.000000e+00 : f32
    %33 = vector.broadcast %cst_17 : f32 to vector<8x256xf32>
    %34 = arith.maximumf %32, %33 : vector<8x256xf32>
    %c17_i32 = arith.constant 17 : i32
    %35 = tpu.dynamic_rotate %34 by %c17_i32 dim 1 : vector<8x256xf32>, i32 -> vector<8x256xf32>
    %c16_i32_18 = arith.constant 16 : i32
    %36 = vector.broadcast %c16_i32_18 : i32 to vector<8x256xi32>
    %37 = arith.cmpi sge, %0, %36 : vector<8x256xi32>
    %c1_i32_19 = arith.constant 1 : i32
    %38 = vector.broadcast %c1_i32_19 : i32 to vector<8x256xi32>
    %39 = arith.cmpi sge, %16, %38 : vector<8x256xi32>
    %40 = arith.andi %37, %39 : vector<8x256xi1>
    %cst_20 = arith.constant 0.000000e+00 : f32
    %41 = vector.broadcast %cst_20 : f32 to vector<8x256xf32>
    %42 = arith.select %40, %35, %41 : vector<8x256xi1>, vector<8x256xf32>
    %c0_21 = arith.constant 0 : index
    %c0_22 = arith.constant 0 : index
    %43 = vector.load %arg10[%c0_21, %c0_22] : memref<216x256xf32, #tpu.memory_space<vmem>>, vector<8x256xf32>
    tpu.vector_store %arg10[%c0_21, %c0_22], %42 {strides = array<i32>} : memref<216x256xf32, #tpu.memory_space<vmem>>, vector<8x256xf32>,
    %c16_i32_23 = arith.constant 16 : i32
    %44 = tpu.dynamic_rotate %34 by %c16_i32_23 dim 1 : vector<8x256xf32>, i32 -> vector<8x256xf32>
    %c16_i32_24 = arith.constant 16 : i32
    %45 = vector.broadcast %c16_i32_24 : i32 to vector<8x256xi32>
    %46 = arith.cmpi sge, %0, %45 : vector<8x256xi32>
    %cst_25 = arith.constant 0.000000e+00 : f32
    %47 = vector.broadcast %cst_25 : f32 to vector<8x256xf32>
    %48 = arith.select %46, %44, %47 : vector<8x256xi1>, vector<8x256xf32>
    %c8 = arith.constant 8 : index
    %c0_26 = arith.constant 0 : index
    %49 = vector.load %arg10[%c8, %c0_26] : memref<216x256xf32, #tpu.memory_space<vmem>>, vector<8x256xf32>
    tpu.vector_store %arg10[%c8, %c0_26], %48 {strides = array<i32>} : memref<216x256xf32, #tpu.memory_space<vmem>>, vector<8x256xf32>,
    %c15_i32 = arith.constant 15 : i32
    %50 = tpu.dynamic_rotate %34 by %c15_i32 dim 1 : vector<8x256xf32>, i32 -> vector<8x256xf32>
    %c16_i32_27 = arith.constant 16 : i32
    %51 = vector.broadcast %c16_i32_27 : i32 to vector<8x256xi32>
    %52 = arith.cmpi sge, %0, %51 : vector<8x256xi32>
    %c15_i32_28 = arith.constant 15 : i32
    %53 = vector.broadcast %c15_i32_28 : i32 to vector<8x256xi32>
    %54 = arith.cmpi slt, %16, %53 : vector<8x256xi32>
    %55 = arith.andi %52, %54 : vector<8x256xi1>
    %cst_29 = arith.constant 0.000000e+00 : f32
    %56 = vector.broadcast %cst_29 : f32 to vector<8x256xf32>
    %57 = arith.select %55, %50, %56 : vector<8x256xi1>, vector<8x256xf32>
    %c16 = arith.constant 16 : index
    %c0_30 = arith.constant 0 : index
    %58 = vector.load %arg10[%c16, %c0_30] : memref<216x256xf32, #tpu.memory_space<vmem>>, vector<8x256xf32>
    tpu.vector_store %arg10[%c16, %c0_30], %57 {strides = array<i32>} : memref<216x256xf32, #tpu.memory_space<vmem>>, vector<8x256xf32>,
    %c1_i32_31 = arith.constant 1 : i32
    %59 = tpu.dynamic_rotate %34 by %c1_i32_31 dim 1 : vector<8x256xf32>, i32 -> vector<8x256xf32>
    %c1_i32_32 = arith.constant 1 : i32
    %60 = vector.broadcast %c1_i32_32 : i32 to vector<8x256xi32>
    %61 = arith.cmpi sge, %16, %60 : vector<8x256xi32>
    %cst_33 = arith.constant 0.000000e+00 : f32
    %62 = vector.broadcast %cst_33 : f32 to vector<8x256xf32>
    %63 = arith.select %61, %59, %62 : vector<8x256xi1>, vector<8x256xf32>
    %c24 = arith.constant 24 : index
    %c0_34 = arith.constant 0 : index
    %64 = vector.load %arg10[%c24, %c0_34] : memref<216x256xf32, #tpu.memory_space<vmem>>, vector<8x256xf32>
    tpu.vector_store %arg10[%c24, %c0_34], %63 {strides = array<i32>} : memref<216x256xf32, #tpu.memory_space<vmem>>, vector<8x256xf32>,
    %c32 = arith.constant 32 : index
    %c0_35 = arith.constant 0 : index
    %65 = vector.load %arg10[%c32, %c0_35] : memref<216x256xf32, #tpu.memory_space<vmem>>, vector<8x256xf32>
    tpu.vector_store %arg10[%c32, %c0_35], %34 {strides = array<i32>} : memref<216x256xf32, #tpu.memory_space<vmem>>, vector<8x256xf32>,
    %c255_i32 = arith.constant 255 : i32
    %66 = tpu.dynamic_rotate %34 by %c255_i32 dim 1 : vector<8x256xf32>, i32 -> vector<8x256xf32>
    %c15_i32_36 = arith.constant 15 : i32
    %67 = vector.broadcast %c15_i32_36 : i32 to vector<8x256xi32>
    %68 = arith.cmpi slt, %16, %67 : vector<8x256xi32>
    %cst_37 = arith.constant 0.000000e+00 : f32
    %69 = vector.broadcast %cst_37 : f32 to vector<8x256xf32>
    %70 = arith.select %68, %66, %69 : vector<8x256xi1>, vector<8x256xf32>
    %c40 = arith.constant 40 : index
    %c0_38 = arith.constant 0 : index
    %71 = vector.load %arg10[%c40, %c0_38] : memref<216x256xf32, #tpu.memory_space<vmem>>, vector<8x256xf32>
    tpu.vector_store %arg10[%c40, %c0_38], %70 {strides = array<i32>} : memref<216x256xf32, #tpu.memory_space<vmem>>, vector<8x256xf32>,
    %c241_i32 = arith.constant 241 : i32
    %72 = tpu.dynamic_rotate %34 by %c241_i32 dim 1 : vector<8x256xf32>, i32 -> vector<8x256xf32>
    %c240_i32 = arith.constant 240 : i32
    %73 = vector.broadcast %c240_i32 : i32 to vector<8x256xi32>
    %74 = arith.cmpi slt, %0, %73 : vector<8x256xi32>
    %c1_i32_39 = arith.constant 1 : i32
    %75 = vector.broadcast %c1_i32_39 : i32 to vector<8x256xi32>
    %76 = arith.cmpi sge, %16, %75 : vector<8x256xi32>
    %77 = arith.andi %74, %76 : vector<8x256xi1>
    %cst_40 = arith.constant 0.000000e+00 : f32
    %78 = vector.broadcast %cst_40 : f32 to vector<8x256xf32>
    %79 = arith.select %77, %72, %78 : vector<8x256xi1>, vector<8x256xf32>
    %c48 = arith.constant 48 : index
    %c0_41 = arith.constant 0 : index
    %80 = vector.load %arg10[%c48, %c0_41] : memref<216x256xf32, #tpu.memory_space<vmem>>, vector<8x256xf32>
    tpu.vector_store %arg10[%c48, %c0_41], %79 {strides = array<i32>} : memref<216x256xf32, #tpu.memory_space<vmem>>, vector<8x256xf32>,
    %c240_i32_42 = arith.constant 240 : i32
    %81 = tpu.dynamic_rotate %34 by %c240_i32_42 dim 1 : vector<8x256xf32>, i32 -> vector<8x256xf32>
    %c240_i32_43 = arith.constant 240 : i32
    %82 = vector.broadcast %c240_i32_43 : i32 to vector<8x256xi32>
    %83 = arith.cmpi slt, %0, %82 : vector<8x256xi32>
    %cst_44 = arith.constant 0.000000e+00 : f32
    %84 = vector.broadcast %cst_44 : f32 to vector<8x256xf32>
    %85 = arith.select %83, %81, %84 : vector<8x256xi1>, vector<8x256xf32>
    %c56 = arith.constant 56 : index
    %c0_45 = arith.constant 0 : index
    %86 = vector.load %arg10[%c56, %c0_45] : memref<216x256xf32, #tpu.memory_space<vmem>>, vector<8x256xf32>
    tpu.vector_store %arg10[%c56, %c0_45], %85 {strides = array<i32>} : memref<216x256xf32, #tpu.memory_space<vmem>>, vector<8x256xf32>,
    %c239_i32 = arith.constant 239 : i32
    %87 = tpu.dynamic_rotate %34 by %c239_i32 dim 1 : vector<8x256xf32>, i32 -> vector<8x256xf32>
    %c240_i32_46 = arith.constant 240 : i32
    %88 = vector.broadcast %c240_i32_46 : i32 to vector<8x256xi32>
    %89 = arith.cmpi slt, %0, %88 : vector<8x256xi32>
    %c15_i32_47 = arith.constant 15 : i32
    %90 = vector.broadcast %c15_i32_47 : i32 to vector<8x256xi32>
    %91 = arith.cmpi slt, %16, %90 : vector<8x256xi32>
    %92 = arith.andi %89, %91 : vector<8x256xi1>
    %cst_48 = arith.constant 0.000000e+00 : f32
    %93 = vector.broadcast %cst_48 : f32 to vector<8x256xf32>
    %94 = arith.select %92, %87, %93 : vector<8x256xi1>, vector<8x256xf32>
    %c64 = arith.constant 64 : index
    %c0_49 = arith.constant 0 : index
    %95 = vector.load %arg10[%c64, %c0_49] : memref<216x256xf32, #tpu.memory_space<vmem>>, vector<8x256xf32>
    tpu.vector_store %arg10[%c64, %c0_49], %94 {strides = array<i32>} : memref<216x256xf32, #tpu.memory_space<vmem>>, vector<8x256xf32>,
    %c0_50 = arith.constant 0 : index
    %c0_51 = arith.constant 0 : index
    %96 = vector.load %arg6[%c0_50, %c0_51] : memref<8x72xf32, #tpu.memory_space<vmem>>, vector<8x72xf32>
    %c0_52 = arith.constant 0 : index
    %c0_53 = arith.constant 0 : index
    %97 = vector.load %arg10[%c0_52, %c0_53] : memref<216x256xf32, #tpu.memory_space<vmem>>, vector<72x256xf32>
    %cst_54 = arith.constant dense<0.000000e+00> : vector<8x256xf32>
    %98 = tpu.matmul %96, %97, %cst_54 {dimension_numbers = #tpu.dot_dimension_numbers<[1], [0], [0], [1], [0, 0, 1, 1], [], []>} : vector<8x72xf32>, vector<72x256xf32>, vector<8x256xf32> -> vector<8x256xf32>
    %c8_55 = arith.constant 8 : index
    %c0_56 = arith.constant 0 : index
    %99 = vector.load %arg3[%c8_55, %c0_56] : memref<32x1xf32, #tpu.memory_space<vmem>>, vector<8x1xf32>
    %100 = vector.broadcast %99 : vector<8x1xf32> to vector<8x256xf32>
    %101 = arith.addf %98, %100 : vector<8x256xf32>
    %c0_57 = arith.constant 0 : index
    %c1 = arith.constant 1 : index
    %c0_58 = arith.constant 0 : index
    %c0_59 = arith.constant 0 : index
    %102 = vector.load %arg9[%c0_57, %c1, %c0_58, %c0_59] : memref<1x4x8x256xf32, #tpu.memory_space<vmem>>, vector<1x1x8x256xf32>
    %103 = vector.shape_cast %102 : vector<1x1x8x256xf32> to vector<8x256xf32>
    %104 = vector.shape_cast %101 : vector<8x256xf32> to vector<1x1x8x256xf32>
    tpu.vector_store %arg9[%c0_57, %c1, %c0_58, %c0_59], %104 {strides = array<i32>} : memref<1x4x8x256xf32, #tpu.memory_space<vmem>>, vector<1x1x8x256xf32>,
    %c8_60 = arith.constant 8 : index
    %c0_61 = arith.constant 0 : index
    %105 = vector.load %arg4[%c8_60, %c0_61] : memref<48x1xf32, #tpu.memory_space<vmem>>, vector<8x1xf32>
    %106 = vector.broadcast %105 : vector<8x1xf32> to vector<8x256xf32>
    %107 = arith.mulf %23, %106 : vector<8x256xf32>
    %c8_62 = arith.constant 8 : index
    %c0_63 = arith.constant 0 : index
    %108 = vector.load %arg5[%c8_62, %c0_63] : memref<48x1xf32, #tpu.memory_space<vmem>>, vector<8x1xf32>
    %109 = vector.broadcast %108 : vector<8x1xf32> to vector<8x256xf32>
    %110 = arith.addf %107, %109 : vector<8x256xf32>
    %cst_64 = arith.constant 0.000000e+00 : f32
    %111 = vector.broadcast %cst_64 : f32 to vector<8x256xf32>
    %112 = arith.maximumf %110, %111 : vector<8x256xf32>
    %c17_i32_65 = arith.constant 17 : i32
    %113 = tpu.dynamic_rotate %112 by %c17_i32_65 dim 1 : vector<8x256xf32>, i32 -> vector<8x256xf32>
    %c16_i32_66 = arith.constant 16 : i32
    %114 = vector.broadcast %c16_i32_66 : i32 to vector<8x256xi32>
    %115 = arith.cmpi sge, %0, %114 : vector<8x256xi32>
    %c1_i32_67 = arith.constant 1 : i32
    %116 = vector.broadcast %c1_i32_67 : i32 to vector<8x256xi32>
    %117 = arith.cmpi sge, %16, %116 : vector<8x256xi32>
    %118 = arith.andi %115, %117 : vector<8x256xi1>
    %cst_68 = arith.constant 0.000000e+00 : f32
    %119 = vector.broadcast %cst_68 : f32 to vector<8x256xf32>
    %120 = arith.select %118, %113, %119 : vector<8x256xi1>, vector<8x256xf32>
    %c0_69 = arith.constant 0 : index
    %c0_70 = arith.constant 0 : index
    %121 = vector.load %arg10[%c0_69, %c0_70] : memref<216x256xf32, #tpu.memory_space<vmem>>, vector<8x256xf32>
    tpu.vector_store %arg10[%c0_69, %c0_70], %120 {strides = array<i32>} : memref<216x256xf32, #tpu.memory_space<vmem>>, vector<8x256xf32>,
    %c16_i32_71 = arith.constant 16 : i32
    %122 = tpu.dynamic_rotate %112 by %c16_i32_71 dim 1 : vector<8x256xf32>, i32 -> vector<8x256xf32>
    %c16_i32_72 = arith.constant 16 : i32
    %123 = vector.broadcast %c16_i32_72 : i32 to vector<8x256xi32>
    %124 = arith.cmpi sge, %0, %123 : vector<8x256xi32>
    %cst_73 = arith.constant 0.000000e+00 : f32
    %125 = vector.broadcast %cst_73 : f32 to vector<8x256xf32>
    %126 = arith.select %124, %122, %125 : vector<8x256xi1>, vector<8x256xf32>
    %c8_74 = arith.constant 8 : index
    %c0_75 = arith.constant 0 : index
    %127 = vector.load %arg10[%c8_74, %c0_75] : memref<216x256xf32, #tpu.memory_space<vmem>>, vector<8x256xf32>
    tpu.vector_store %arg10[%c8_74, %c0_75], %126 {strides = array<i32>} : memref<216x256xf32, #tpu.memory_space<vmem>>, vector<8x256xf32>,
    %c15_i32_76 = arith.constant 15 : i32
    %128 = tpu.dynamic_rotate %112 by %c15_i32_76 dim 1 : vector<8x256xf32>, i32 -> vector<8x256xf32>
    %c16_i32_77 = arith.constant 16 : i32
    %129 = vector.broadcast %c16_i32_77 : i32 to vector<8x256xi32>
    %130 = arith.cmpi sge, %0, %129 : vector<8x256xi32>
    %c15_i32_78 = arith.constant 15 : i32
    %131 = vector.broadcast %c15_i32_78 : i32 to vector<8x256xi32>
    %132 = arith.cmpi slt, %16, %131 : vector<8x256xi32>
    %133 = arith.andi %130, %132 : vector<8x256xi1>
    %cst_79 = arith.constant 0.000000e+00 : f32
    %134 = vector.broadcast %cst_79 : f32 to vector<8x256xf32>
    %135 = arith.select %133, %128, %134 : vector<8x256xi1>, vector<8x256xf32>
    %c16_80 = arith.constant 16 : index
    %c0_81 = arith.constant 0 : index
    %136 = vector.load %arg10[%c16_80, %c0_81] : memref<216x256xf32, #tpu.memory_space<vmem>>, vector<8x256xf32>
    tpu.vector_store %arg10[%c16_80, %c0_81], %135 {strides = array<i32>} : memref<216x256xf32, #tpu.memory_space<vmem>>, vector<8x256xf32>,
    %c1_i32_82 = arith.constant 1 : i32
    %137 = tpu.dynamic_rotate %112 by %c1_i32_82 dim 1 : vector<8x256xf32>, i32 -> vector<8x256xf32>
    %c1_i32_83 = arith.constant 1 : i32
    %138 = vector.broadcast %c1_i32_83 : i32 to vector<8x256xi32>
    %139 = arith.cmpi sge, %16, %138 : vector<8x256xi32>
    %cst_84 = arith.constant 0.000000e+00 : f32
    %140 = vector.broadcast %cst_84 : f32 to vector<8x256xf32>
    %141 = arith.select %139, %137, %140 : vector<8x256xi1>, vector<8x256xf32>
    %c24_85 = arith.constant 24 : index
    %c0_86 = arith.constant 0 : index
    %142 = vector.load %arg10[%c24_85, %c0_86] : memref<216x256xf32, #tpu.memory_space<vmem>>, vector<8x256xf32>
    tpu.vector_store %arg10[%c24_85, %c0_86], %141 {strides = array<i32>} : memref<216x256xf32, #tpu.memory_space<vmem>>, vector<8x256xf32>,
    %c32_87 = arith.constant 32 : index
    %c0_88 = arith.constant 0 : index
    %143 = vector.load %arg10[%c32_87, %c0_88] : memref<216x256xf32, #tpu.memory_space<vmem>>, vector<8x256xf32>
    tpu.vector_store %arg10[%c32_87, %c0_88], %112 {strides = array<i32>} : memref<216x256xf32, #tpu.memory_space<vmem>>, vector<8x256xf32>,
    %c255_i32_89 = arith.constant 255 : i32
    %144 = tpu.dynamic_rotate %112 by %c255_i32_89 dim 1 : vector<8x256xf32>, i32 -> vector<8x256xf32>
    %c15_i32_90 = arith.constant 15 : i32
    %145 = vector.broadcast %c15_i32_90 : i32 to vector<8x256xi32>
    %146 = arith.cmpi slt, %16, %145 : vector<8x256xi32>
    %cst_91 = arith.constant 0.000000e+00 : f32
    %147 = vector.broadcast %cst_91 : f32 to vector<8x256xf32>
    %148 = arith.select %146, %144, %147 : vector<8x256xi1>, vector<8x256xf32>
    %c40_92 = arith.constant 40 : index
    %c0_93 = arith.constant 0 : index
    %149 = vector.load %arg10[%c40_92, %c0_93] : memref<216x256xf32, #tpu.memory_space<vmem>>, vector<8x256xf32>
    tpu.vector_store %arg10[%c40_92, %c0_93], %148 {strides = array<i32>} : memref<216x256xf32, #tpu.memory_space<vmem>>, vector<8x256xf32>,
    %c241_i32_94 = arith.constant 241 : i32
    %150 = tpu.dynamic_rotate %112 by %c241_i32_94 dim 1 : vector<8x256xf32>, i32 -> vector<8x256xf32>
    %c240_i32_95 = arith.constant 240 : i32
    %151 = vector.broadcast %c240_i32_95 : i32 to vector<8x256xi32>
    %152 = arith.cmpi slt, %0, %151 : vector<8x256xi32>
    %c1_i32_96 = arith.constant 1 : i32
    %153 = vector.broadcast %c1_i32_96 : i32 to vector<8x256xi32>
    %154 = arith.cmpi sge, %16, %153 : vector<8x256xi32>
    %155 = arith.andi %152, %154 : vector<8x256xi1>
    %cst_97 = arith.constant 0.000000e+00 : f32
    %156 = vector.broadcast %cst_97 : f32 to vector<8x256xf32>
    %157 = arith.select %155, %150, %156 : vector<8x256xi1>, vector<8x256xf32>
    %c48_98 = arith.constant 48 : index
    %c0_99 = arith.constant 0 : index
    %158 = vector.load %arg10[%c48_98, %c0_99] : memref<216x256xf32, #tpu.memory_space<vmem>>, vector<8x256xf32>
    tpu.vector_store %arg10[%c48_98, %c0_99], %157 {strides = array<i32>} : memref<216x256xf32, #tpu.memory_space<vmem>>, vector<8x256xf32>,
    %c240_i32_100 = arith.constant 240 : i32
    %159 = tpu.dynamic_rotate %112 by %c240_i32_100 dim 1 : vector<8x256xf32>, i32 -> vector<8x256xf32>
    %c240_i32_101 = arith.constant 240 : i32
    %160 = vector.broadcast %c240_i32_101 : i32 to vector<8x256xi32>
    %161 = arith.cmpi slt, %0, %160 : vector<8x256xi32>
    %cst_102 = arith.constant 0.000000e+00 : f32
    %162 = vector.broadcast %cst_102 : f32 to vector<8x256xf32>
    %163 = arith.select %161, %159, %162 : vector<8x256xi1>, vector<8x256xf32>
    %c56_103 = arith.constant 56 : index
    %c0_104 = arith.constant 0 : index
    %164 = vector.load %arg10[%c56_103, %c0_104] : memref<216x256xf32, #tpu.memory_space<vmem>>, vector<8x256xf32>
    tpu.vector_store %arg10[%c56_103, %c0_104], %163 {strides = array<i32>} : memref<216x256xf32, #tpu.memory_space<vmem>>, vector<8x256xf32>,
    %c239_i32_105 = arith.constant 239 : i32
    %165 = tpu.dynamic_rotate %112 by %c239_i32_105 dim 1 : vector<8x256xf32>, i32 -> vector<8x256xf32>
    %c240_i32_106 = arith.constant 240 : i32
    %166 = vector.broadcast %c240_i32_106 : i32 to vector<8x256xi32>
    %167 = arith.cmpi slt, %0, %166 : vector<8x256xi32>
    %c15_i32_107 = arith.constant 15 : i32
    %168 = vector.broadcast %c15_i32_107 : i32 to vector<8x256xi32>
    %169 = arith.cmpi slt, %16, %168 : vector<8x256xi32>
    %170 = arith.andi %167, %169 : vector<8x256xi1>
    %cst_108 = arith.constant 0.000000e+00 : f32
    %171 = vector.broadcast %cst_108 : f32 to vector<8x256xf32>
    %172 = arith.select %170, %165, %171 : vector<8x256xi1>, vector<8x256xf32>
    %c64_109 = arith.constant 64 : index
    %c0_110 = arith.constant 0 : index
    %173 = vector.load %arg10[%c64_109, %c0_110] : memref<216x256xf32, #tpu.memory_space<vmem>>, vector<8x256xf32>
    tpu.vector_store %arg10[%c64_109, %c0_110], %172 {strides = array<i32>} : memref<216x256xf32, #tpu.memory_space<vmem>>, vector<8x256xf32>,
    %c16_111 = arith.constant 16 : index
    %c0_112 = arith.constant 0 : index
    %174 = vector.load %arg4[%c16_111, %c0_112] : memref<48x1xf32, #tpu.memory_space<vmem>>, vector<8x1xf32>
    %175 = vector.broadcast %174 : vector<8x1xf32> to vector<8x256xf32>
    %176 = arith.mulf %101, %175 : vector<8x256xf32>
    %c16_113 = arith.constant 16 : index
    %c0_114 = arith.constant 0 : index
    %177 = vector.load %arg5[%c16_113, %c0_114] : memref<48x1xf32, #tpu.memory_space<vmem>>, vector<8x1xf32>
    %178 = vector.broadcast %177 : vector<8x1xf32> to vector<8x256xf32>
    %179 = arith.addf %176, %178 : vector<8x256xf32>
    %cst_115 = arith.constant 0.000000e+00 : f32
    %180 = vector.broadcast %cst_115 : f32 to vector<8x256xf32>
    %181 = arith.maximumf %179, %180 : vector<8x256xf32>
    %c34_i32 = arith.constant 34 : i32
    %182 = tpu.dynamic_rotate %181 by %c34_i32 dim 1 : vector<8x256xf32>, i32 -> vector<8x256xf32>
    %c32_i32 = arith.constant 32 : i32
    %183 = vector.broadcast %c32_i32 : i32 to vector<8x256xi32>
    %184 = arith.cmpi sge, %0, %183 : vector<8x256xi32>
    %c2_i32 = arith.constant 2 : i32
    %185 = vector.broadcast %c2_i32 : i32 to vector<8x256xi32>
    %186 = arith.cmpi sge, %16, %185 : vector<8x256xi32>
    %187 = arith.andi %184, %186 : vector<8x256xi1>
    %cst_116 = arith.constant 0.000000e+00 : f32
    %188 = vector.broadcast %cst_116 : f32 to vector<8x256xf32>
    %189 = arith.select %187, %182, %188 : vector<8x256xi1>, vector<8x256xf32>
    %c72 = arith.constant 72 : index
    %c0_117 = arith.constant 0 : index
    %190 = vector.load %arg10[%c72, %c0_117] : memref<216x256xf32, #tpu.memory_space<vmem>>, vector<8x256xf32>
    tpu.vector_store %arg10[%c72, %c0_117], %189 {strides = array<i32>} : memref<216x256xf32, #tpu.memory_space<vmem>>, vector<8x256xf32>,
    %c32_i32_118 = arith.constant 32 : i32
    %191 = tpu.dynamic_rotate %181 by %c32_i32_118 dim 1 : vector<8x256xf32>, i32 -> vector<8x256xf32>
    %c32_i32_119 = arith.constant 32 : i32
    %192 = vector.broadcast %c32_i32_119 : i32 to vector<8x256xi32>
    %193 = arith.cmpi sge, %0, %192 : vector<8x256xi32>
    %cst_120 = arith.constant 0.000000e+00 : f32
    %194 = vector.broadcast %cst_120 : f32 to vector<8x256xf32>
    %195 = arith.select %193, %191, %194 : vector<8x256xi1>, vector<8x256xf32>
    %c80 = arith.constant 80 : index
    %c0_121 = arith.constant 0 : index
    %196 = vector.load %arg10[%c80, %c0_121] : memref<216x256xf32, #tpu.memory_space<vmem>>, vector<8x256xf32>
    tpu.vector_store %arg10[%c80, %c0_121], %195 {strides = array<i32>} : memref<216x256xf32, #tpu.memory_space<vmem>>, vector<8x256xf32>,
    %c30_i32 = arith.constant 30 : i32
    %197 = tpu.dynamic_rotate %181 by %c30_i32 dim 1 : vector<8x256xf32>, i32 -> vector<8x256xf32>
    %c32_i32_122 = arith.constant 32 : i32
    %198 = vector.broadcast %c32_i32_122 : i32 to vector<8x256xi32>
    %199 = arith.cmpi sge, %0, %198 : vector<8x256xi32>
    %c14_i32 = arith.constant 14 : i32
    %200 = vector.broadcast %c14_i32 : i32 to vector<8x256xi32>
    %201 = arith.cmpi slt, %16, %200 : vector<8x256xi32>
    %202 = arith.andi %199, %201 : vector<8x256xi1>
    %cst_123 = arith.constant 0.000000e+00 : f32
    %203 = vector.broadcast %cst_123 : f32 to vector<8x256xf32>
    %204 = arith.select %202, %197, %203 : vector<8x256xi1>, vector<8x256xf32>
    %c88 = arith.constant 88 : index
    %c0_124 = arith.constant 0 : index
    %205 = vector.load %arg10[%c88, %c0_124] : memref<216x256xf32, #tpu.memory_space<vmem>>, vector<8x256xf32>
    tpu.vector_store %arg10[%c88, %c0_124], %204 {strides = array<i32>} : memref<216x256xf32, #tpu.memory_space<vmem>>, vector<8x256xf32>,
    %c2_i32_125 = arith.constant 2 : i32
    %206 = tpu.dynamic_rotate %181 by %c2_i32_125 dim 1 : vector<8x256xf32>, i32 -> vector<8x256xf32>
    %c2_i32_126 = arith.constant 2 : i32
    %207 = vector.broadcast %c2_i32_126 : i32 to vector<8x256xi32>
    %208 = arith.cmpi sge, %16, %207 : vector<8x256xi32>
    %cst_127 = arith.constant 0.000000e+00 : f32
    %209 = vector.broadcast %cst_127 : f32 to vector<8x256xf32>
    %210 = arith.select %208, %206, %209 : vector<8x256xi1>, vector<8x256xf32>
    %c96 = arith.constant 96 : index
    %c0_128 = arith.constant 0 : index
    %211 = vector.load %arg10[%c96, %c0_128] : memref<216x256xf32, #tpu.memory_space<vmem>>, vector<8x256xf32>
    tpu.vector_store %arg10[%c96, %c0_128], %210 {strides = array<i32>} : memref<216x256xf32, #tpu.memory_space<vmem>>, vector<8x256xf32>,
    %c104 = arith.constant 104 : index
    %c0_129 = arith.constant 0 : index
    %212 = vector.load %arg10[%c104, %c0_129] : memref<216x256xf32, #tpu.memory_space<vmem>>, vector<8x256xf32>
    tpu.vector_store %arg10[%c104, %c0_129], %181 {strides = array<i32>} : memref<216x256xf32, #tpu.memory_space<vmem>>, vector<8x256xf32>,
    %c254_i32 = arith.constant 254 : i32
    %213 = tpu.dynamic_rotate %181 by %c254_i32 dim 1 : vector<8x256xf32>, i32 -> vector<8x256xf32>
    %c14_i32_130 = arith.constant 14 : i32
    %214 = vector.broadcast %c14_i32_130 : i32 to vector<8x256xi32>
    %215 = arith.cmpi slt, %16, %214 : vector<8x256xi32>
    %cst_131 = arith.constant 0.000000e+00 : f32
    %216 = vector.broadcast %cst_131 : f32 to vector<8x256xf32>
    %217 = arith.select %215, %213, %216 : vector<8x256xi1>, vector<8x256xf32>
    %c112 = arith.constant 112 : index
    %c0_132 = arith.constant 0 : index
    %218 = vector.load %arg10[%c112, %c0_132] : memref<216x256xf32, #tpu.memory_space<vmem>>, vector<8x256xf32>
    tpu.vector_store %arg10[%c112, %c0_132], %217 {strides = array<i32>} : memref<216x256xf32, #tpu.memory_space<vmem>>, vector<8x256xf32>,
    %c226_i32 = arith.constant 226 : i32
    %219 = tpu.dynamic_rotate %181 by %c226_i32 dim 1 : vector<8x256xf32>, i32 -> vector<8x256xf32>
    %c224_i32 = arith.constant 224 : i32
    %220 = vector.broadcast %c224_i32 : i32 to vector<8x256xi32>
    %221 = arith.cmpi slt, %0, %220 : vector<8x256xi32>
    %c2_i32_133 = arith.constant 2 : i32
    %222 = vector.broadcast %c2_i32_133 : i32 to vector<8x256xi32>
    %223 = arith.cmpi sge, %16, %222 : vector<8x256xi32>
    %224 = arith.andi %221, %223 : vector<8x256xi1>
    %cst_134 = arith.constant 0.000000e+00 : f32
    %225 = vector.broadcast %cst_134 : f32 to vector<8x256xf32>
    %226 = arith.select %224, %219, %225 : vector<8x256xi1>, vector<8x256xf32>
    %c120 = arith.constant 120 : index
    %c0_135 = arith.constant 0 : index
    %227 = vector.load %arg10[%c120, %c0_135] : memref<216x256xf32, #tpu.memory_space<vmem>>, vector<8x256xf32>
    tpu.vector_store %arg10[%c120, %c0_135], %226 {strides = array<i32>} : memref<216x256xf32, #tpu.memory_space<vmem>>, vector<8x256xf32>,
    %c224_i32_136 = arith.constant 224 : i32
    %228 = tpu.dynamic_rotate %181 by %c224_i32_136 dim 1 : vector<8x256xf32>, i32 -> vector<8x256xf32>
    %c224_i32_137 = arith.constant 224 : i32
    %229 = vector.broadcast %c224_i32_137 : i32 to vector<8x256xi32>
    %230 = arith.cmpi slt, %0, %229 : vector<8x256xi32>
    %cst_138 = arith.constant 0.000000e+00 : f32
    %231 = vector.broadcast %cst_138 : f32 to vector<8x256xf32>
    %232 = arith.select %230, %228, %231 : vector<8x256xi1>, vector<8x256xf32>
    %c128 = arith.constant 128 : index
    %c0_139 = arith.constant 0 : index
    %233 = vector.load %arg10[%c128, %c0_139] : memref<216x256xf32, #tpu.memory_space<vmem>>, vector<8x256xf32>
    tpu.vector_store %arg10[%c128, %c0_139], %232 {strides = array<i32>} : memref<216x256xf32, #tpu.memory_space<vmem>>, vector<8x256xf32>,
    %c222_i32 = arith.constant 222 : i32
    %234 = tpu.dynamic_rotate %181 by %c222_i32 dim 1 : vector<8x256xf32>, i32 -> vector<8x256xf32>
    %c224_i32_140 = arith.constant 224 : i32
    %235 = vector.broadcast %c224_i32_140 : i32 to vector<8x256xi32>
    %236 = arith.cmpi slt, %0, %235 : vector<8x256xi32>
    %c14_i32_141 = arith.constant 14 : i32
    %237 = vector.broadcast %c14_i32_141 : i32 to vector<8x256xi32>
    %238 = arith.cmpi slt, %16, %237 : vector<8x256xi32>
    %239 = arith.andi %236, %238 : vector<8x256xi1>
    %cst_142 = arith.constant 0.000000e+00 : f32
    %240 = vector.broadcast %cst_142 : f32 to vector<8x256xf32>
    %241 = arith.select %239, %234, %240 : vector<8x256xi1>, vector<8x256xf32>
    %c136 = arith.constant 136 : index
    %c0_143 = arith.constant 0 : index
    %242 = vector.load %arg10[%c136, %c0_143] : memref<216x256xf32, #tpu.memory_space<vmem>>, vector<8x256xf32>
    tpu.vector_store %arg10[%c136, %c0_143], %241 {strides = array<i32>} : memref<216x256xf32, #tpu.memory_space<vmem>>, vector<8x256xf32>,
    %c0_144 = arith.constant 0 : index
    %c0_145 = arith.constant 0 : index
    %243 = vector.load %arg7[%c0_144, %c0_145] : memref<8x144xf32, #tpu.memory_space<vmem>>, vector<8x144xf32>
    %c0_146 = arith.constant 0 : index
    %c0_147 = arith.constant 0 : index
    %244 = vector.load %arg10[%c0_146, %c0_147] : memref<216x256xf32, #tpu.memory_space<vmem>>, vector<144x256xf32>
    %cst_148 = arith.constant dense<0.000000e+00> : vector<8x256xf32>
    %245 = tpu.matmul %243, %244, %cst_148 {dimension_numbers = #tpu.dot_dimension_numbers<[1], [0], [0], [1], [0, 0, 1, 1], [], []>} : vector<8x144xf32>, vector<144x256xf32>, vector<8x256xf32> -> vector<8x256xf32>
    %c16_149 = arith.constant 16 : index
    %c0_150 = arith.constant 0 : index
    %246 = vector.load %arg3[%c16_149, %c0_150] : memref<32x1xf32, #tpu.memory_space<vmem>>, vector<8x1xf32>
    %247 = vector.broadcast %246 : vector<8x1xf32> to vector<8x256xf32>
    %248 = arith.addf %245, %247 : vector<8x256xf32>
    %c0_151 = arith.constant 0 : index
    %c2 = arith.constant 2 : index
    %c0_152 = arith.constant 0 : index
    %c0_153 = arith.constant 0 : index
    %249 = vector.load %arg9[%c0_151, %c2, %c0_152, %c0_153] : memref<1x4x8x256xf32, #tpu.memory_space<vmem>>, vector<1x1x8x256xf32>
    %250 = vector.shape_cast %249 : vector<1x1x8x256xf32> to vector<8x256xf32>
    %251 = vector.shape_cast %248 : vector<8x256xf32> to vector<1x1x8x256xf32>
    tpu.vector_store %arg9[%c0_151, %c2, %c0_152, %c0_153], %251 {strides = array<i32>} : memref<1x4x8x256xf32, #tpu.memory_space<vmem>>, vector<1x1x8x256xf32>,
    %c24_154 = arith.constant 24 : index
    %c0_155 = arith.constant 0 : index
    %252 = vector.load %arg4[%c24_154, %c0_155] : memref<48x1xf32, #tpu.memory_space<vmem>>, vector<8x1xf32>
    %253 = vector.broadcast %252 : vector<8x1xf32> to vector<8x256xf32>
    %254 = arith.mulf %23, %253 : vector<8x256xf32>
    %c24_156 = arith.constant 24 : index
    %c0_157 = arith.constant 0 : index
    %255 = vector.load %arg5[%c24_156, %c0_157] : memref<48x1xf32, #tpu.memory_space<vmem>>, vector<8x1xf32>
    %256 = vector.broadcast %255 : vector<8x1xf32> to vector<8x256xf32>
    %257 = arith.addf %254, %256 : vector<8x256xf32>
    %cst_158 = arith.constant 0.000000e+00 : f32
    %258 = vector.broadcast %cst_158 : f32 to vector<8x256xf32>
    %259 = arith.maximumf %257, %258 : vector<8x256xf32>
    %c17_i32_159 = arith.constant 17 : i32
    %260 = tpu.dynamic_rotate %259 by %c17_i32_159 dim 1 : vector<8x256xf32>, i32 -> vector<8x256xf32>
    %c16_i32_160 = arith.constant 16 : i32
    %261 = vector.broadcast %c16_i32_160 : i32 to vector<8x256xi32>
    %262 = arith.cmpi sge, %0, %261 : vector<8x256xi32>
    %c1_i32_161 = arith.constant 1 : i32
    %263 = vector.broadcast %c1_i32_161 : i32 to vector<8x256xi32>
    %264 = arith.cmpi sge, %16, %263 : vector<8x256xi32>
    %265 = arith.andi %262, %264 : vector<8x256xi1>
    %cst_162 = arith.constant 0.000000e+00 : f32
    %266 = vector.broadcast %cst_162 : f32 to vector<8x256xf32>
    %267 = arith.select %265, %260, %266 : vector<8x256xi1>, vector<8x256xf32>
    %c0_163 = arith.constant 0 : index
    %c0_164 = arith.constant 0 : index
    %268 = vector.load %arg10[%c0_163, %c0_164] : memref<216x256xf32, #tpu.memory_space<vmem>>, vector<8x256xf32>
    tpu.vector_store %arg10[%c0_163, %c0_164], %267 {strides = array<i32>} : memref<216x256xf32, #tpu.memory_space<vmem>>, vector<8x256xf32>,
    %c16_i32_165 = arith.constant 16 : i32
    %269 = tpu.dynamic_rotate %259 by %c16_i32_165 dim 1 : vector<8x256xf32>, i32 -> vector<8x256xf32>
    %c16_i32_166 = arith.constant 16 : i32
    %270 = vector.broadcast %c16_i32_166 : i32 to vector<8x256xi32>
    %271 = arith.cmpi sge, %0, %270 : vector<8x256xi32>
    %cst_167 = arith.constant 0.000000e+00 : f32
    %272 = vector.broadcast %cst_167 : f32 to vector<8x256xf32>
    %273 = arith.select %271, %269, %272 : vector<8x256xi1>, vector<8x256xf32>
    %c8_168 = arith.constant 8 : index
    %c0_169 = arith.constant 0 : index
    %274 = vector.load %arg10[%c8_168, %c0_169] : memref<216x256xf32, #tpu.memory_space<vmem>>, vector<8x256xf32>
    tpu.vector_store %arg10[%c8_168, %c0_169], %273 {strides = array<i32>} : memref<216x256xf32, #tpu.memory_space<vmem>>, vector<8x256xf32>,
    %c15_i32_170 = arith.constant 15 : i32
    %275 = tpu.dynamic_rotate %259 by %c15_i32_170 dim 1 : vector<8x256xf32>, i32 -> vector<8x256xf32>
    %c16_i32_171 = arith.constant 16 : i32
    %276 = vector.broadcast %c16_i32_171 : i32 to vector<8x256xi32>
    %277 = arith.cmpi sge, %0, %276 : vector<8x256xi32>
    %c15_i32_172 = arith.constant 15 : i32
    %278 = vector.broadcast %c15_i32_172 : i32 to vector<8x256xi32>
    %279 = arith.cmpi slt, %16, %278 : vector<8x256xi32>
    %280 = arith.andi %277, %279 : vector<8x256xi1>
    %cst_173 = arith.constant 0.000000e+00 : f32
    %281 = vector.broadcast %cst_173 : f32 to vector<8x256xf32>
    %282 = arith.select %280, %275, %281 : vector<8x256xi1>, vector<8x256xf32>
    %c16_174 = arith.constant 16 : index
    %c0_175 = arith.constant 0 : index
    %283 = vector.load %arg10[%c16_174, %c0_175] : memref<216x256xf32, #tpu.memory_space<vmem>>, vector<8x256xf32>
    tpu.vector_store %arg10[%c16_174, %c0_175], %282 {strides = array<i32>} : memref<216x256xf32, #tpu.memory_space<vmem>>, vector<8x256xf32>,
    %c1_i32_176 = arith.constant 1 : i32
    %284 = tpu.dynamic_rotate %259 by %c1_i32_176 dim 1 : vector<8x256xf32>, i32 -> vector<8x256xf32>
    %c1_i32_177 = arith.constant 1 : i32
    %285 = vector.broadcast %c1_i32_177 : i32 to vector<8x256xi32>
    %286 = arith.cmpi sge, %16, %285 : vector<8x256xi32>
    %cst_178 = arith.constant 0.000000e+00 : f32
    %287 = vector.broadcast %cst_178 : f32 to vector<8x256xf32>
    %288 = arith.select %286, %284, %287 : vector<8x256xi1>, vector<8x256xf32>
    %c24_179 = arith.constant 24 : index
    %c0_180 = arith.constant 0 : index
    %289 = vector.load %arg10[%c24_179, %c0_180] : memref<216x256xf32, #tpu.memory_space<vmem>>, vector<8x256xf32>
    tpu.vector_store %arg10[%c24_179, %c0_180], %288 {strides = array<i32>} : memref<216x256xf32, #tpu.memory_space<vmem>>, vector<8x256xf32>,
    %c32_181 = arith.constant 32 : index
    %c0_182 = arith.constant 0 : index
    %290 = vector.load %arg10[%c32_181, %c0_182] : memref<216x256xf32, #tpu.memory_space<vmem>>, vector<8x256xf32>
    tpu.vector_store %arg10[%c32_181, %c0_182], %259 {strides = array<i32>} : memref<216x256xf32, #tpu.memory_space<vmem>>, vector<8x256xf32>,
    %c255_i32_183 = arith.constant 255 : i32
    %291 = tpu.dynamic_rotate %259 by %c255_i32_183 dim 1 : vector<8x256xf32>, i32 -> vector<8x256xf32>
    %c15_i32_184 = arith.constant 15 : i32
    %292 = vector.broadcast %c15_i32_184 : i32 to vector<8x256xi32>
    %293 = arith.cmpi slt, %16, %292 : vector<8x256xi32>
    %cst_185 = arith.constant 0.000000e+00 : f32
    %294 = vector.broadcast %cst_185 : f32 to vector<8x256xf32>
    %295 = arith.select %293, %291, %294 : vector<8x256xi1>, vector<8x256xf32>
    %c40_186 = arith.constant 40 : index
    %c0_187 = arith.constant 0 : index
    %296 = vector.load %arg10[%c40_186, %c0_187] : memref<216x256xf32, #tpu.memory_space<vmem>>, vector<8x256xf32>
    tpu.vector_store %arg10[%c40_186, %c0_187], %295 {strides = array<i32>} : memref<216x256xf32, #tpu.memory_space<vmem>>, vector<8x256xf32>,
    %c241_i32_188 = arith.constant 241 : i32
    %297 = tpu.dynamic_rotate %259 by %c241_i32_188 dim 1 : vector<8x256xf32>, i32 -> vector<8x256xf32>
    %c240_i32_189 = arith.constant 240 : i32
    %298 = vector.broadcast %c240_i32_189 : i32 to vector<8x256xi32>
    %299 = arith.cmpi slt, %0, %298 : vector<8x256xi32>
    %c1_i32_190 = arith.constant 1 : i32
    %300 = vector.broadcast %c1_i32_190 : i32 to vector<8x256xi32>
    %301 = arith.cmpi sge, %16, %300 : vector<8x256xi32>
    %302 = arith.andi %299, %301 : vector<8x256xi1>
    %cst_191 = arith.constant 0.000000e+00 : f32
    %303 = vector.broadcast %cst_191 : f32 to vector<8x256xf32>
    %304 = arith.select %302, %297, %303 : vector<8x256xi1>, vector<8x256xf32>
    %c48_192 = arith.constant 48 : index
    %c0_193 = arith.constant 0 : index
    %305 = vector.load %arg10[%c48_192, %c0_193] : memref<216x256xf32, #tpu.memory_space<vmem>>, vector<8x256xf32>
    tpu.vector_store %arg10[%c48_192, %c0_193], %304 {strides = array<i32>} : memref<216x256xf32, #tpu.memory_space<vmem>>, vector<8x256xf32>,
    %c240_i32_194 = arith.constant 240 : i32
    %306 = tpu.dynamic_rotate %259 by %c240_i32_194 dim 1 : vector<8x256xf32>, i32 -> vector<8x256xf32>
    %c240_i32_195 = arith.constant 240 : i32
    %307 = vector.broadcast %c240_i32_195 : i32 to vector<8x256xi32>
    %308 = arith.cmpi slt, %0, %307 : vector<8x256xi32>
    %cst_196 = arith.constant 0.000000e+00 : f32
    %309 = vector.broadcast %cst_196 : f32 to vector<8x256xf32>
    %310 = arith.select %308, %306, %309 : vector<8x256xi1>, vector<8x256xf32>
    %c56_197 = arith.constant 56 : index
    %c0_198 = arith.constant 0 : index
    %311 = vector.load %arg10[%c56_197, %c0_198] : memref<216x256xf32, #tpu.memory_space<vmem>>, vector<8x256xf32>
    tpu.vector_store %arg10[%c56_197, %c0_198], %310 {strides = array<i32>} : memref<216x256xf32, #tpu.memory_space<vmem>>, vector<8x256xf32>,
    %c239_i32_199 = arith.constant 239 : i32
    %312 = tpu.dynamic_rotate %259 by %c239_i32_199 dim 1 : vector<8x256xf32>, i32 -> vector<8x256xf32>
    %c240_i32_200 = arith.constant 240 : i32
    %313 = vector.broadcast %c240_i32_200 : i32 to vector<8x256xi32>
    %314 = arith.cmpi slt, %0, %313 : vector<8x256xi32>
    %c15_i32_201 = arith.constant 15 : i32
    %315 = vector.broadcast %c15_i32_201 : i32 to vector<8x256xi32>
    %316 = arith.cmpi slt, %16, %315 : vector<8x256xi32>
    %317 = arith.andi %314, %316 : vector<8x256xi1>
    %cst_202 = arith.constant 0.000000e+00 : f32
    %318 = vector.broadcast %cst_202 : f32 to vector<8x256xf32>
    %319 = arith.select %317, %312, %318 : vector<8x256xi1>, vector<8x256xf32>
    %c64_203 = arith.constant 64 : index
    %c0_204 = arith.constant 0 : index
    %320 = vector.load %arg10[%c64_203, %c0_204] : memref<216x256xf32, #tpu.memory_space<vmem>>, vector<8x256xf32>
    tpu.vector_store %arg10[%c64_203, %c0_204], %319 {strides = array<i32>} : memref<216x256xf32, #tpu.memory_space<vmem>>, vector<8x256xf32>,
    %c32_205 = arith.constant 32 : index
    %c0_206 = arith.constant 0 : index
    %321 = vector.load %arg4[%c32_205, %c0_206] : memref<48x1xf32, #tpu.memory_space<vmem>>, vector<8x1xf32>
    %322 = vector.broadcast %321 : vector<8x1xf32> to vector<8x256xf32>
    %323 = arith.mulf %101, %322 : vector<8x256xf32>
    %c32_207 = arith.constant 32 : index
    %c0_208 = arith.constant 0 : index
    %324 = vector.load %arg5[%c32_207, %c0_208] : memref<48x1xf32, #tpu.memory_space<vmem>>, vector<8x1xf32>
    %325 = vector.broadcast %324 : vector<8x1xf32> to vector<8x256xf32>
    %326 = arith.addf %323, %325 : vector<8x256xf32>
    %cst_209 = arith.constant 0.000000e+00 : f32
    %327 = vector.broadcast %cst_209 : f32 to vector<8x256xf32>
    %328 = arith.maximumf %326, %327 : vector<8x256xf32>
    %c34_i32_210 = arith.constant 34 : i32
    %329 = tpu.dynamic_rotate %328 by %c34_i32_210 dim 1 : vector<8x256xf32>, i32 -> vector<8x256xf32>
    %c32_i32_211 = arith.constant 32 : i32
    %330 = vector.broadcast %c32_i32_211 : i32 to vector<8x256xi32>
    %331 = arith.cmpi sge, %0, %330 : vector<8x256xi32>
    %c2_i32_212 = arith.constant 2 : i32
    %332 = vector.broadcast %c2_i32_212 : i32 to vector<8x256xi32>
    %333 = arith.cmpi sge, %16, %332 : vector<8x256xi32>
    %334 = arith.andi %331, %333 : vector<8x256xi1>
    %cst_213 = arith.constant 0.000000e+00 : f32
    %335 = vector.broadcast %cst_213 : f32 to vector<8x256xf32>
    %336 = arith.select %334, %329, %335 : vector<8x256xi1>, vector<8x256xf32>
    %c72_214 = arith.constant 72 : index
    %c0_215 = arith.constant 0 : index
    %337 = vector.load %arg10[%c72_214, %c0_215] : memref<216x256xf32, #tpu.memory_space<vmem>>, vector<8x256xf32>
    tpu.vector_store %arg10[%c72_214, %c0_215], %336 {strides = array<i32>} : memref<216x256xf32, #tpu.memory_space<vmem>>, vector<8x256xf32>,
    %c32_i32_216 = arith.constant 32 : i32
    %338 = tpu.dynamic_rotate %328 by %c32_i32_216 dim 1 : vector<8x256xf32>, i32 -> vector<8x256xf32>
    %c32_i32_217 = arith.constant 32 : i32
    %339 = vector.broadcast %c32_i32_217 : i32 to vector<8x256xi32>
    %340 = arith.cmpi sge, %0, %339 : vector<8x256xi32>
    %cst_218 = arith.constant 0.000000e+00 : f32
    %341 = vector.broadcast %cst_218 : f32 to vector<8x256xf32>
    %342 = arith.select %340, %338, %341 : vector<8x256xi1>, vector<8x256xf32>
    %c80_219 = arith.constant 80 : index
    %c0_220 = arith.constant 0 : index
    %343 = vector.load %arg10[%c80_219, %c0_220] : memref<216x256xf32, #tpu.memory_space<vmem>>, vector<8x256xf32>
    tpu.vector_store %arg10[%c80_219, %c0_220], %342 {strides = array<i32>} : memref<216x256xf32, #tpu.memory_space<vmem>>, vector<8x256xf32>,
    %c30_i32_221 = arith.constant 30 : i32
    %344 = tpu.dynamic_rotate %328 by %c30_i32_221 dim 1 : vector<8x256xf32>, i32 -> vector<8x256xf32>
    %c32_i32_222 = arith.constant 32 : i32
    %345 = vector.broadcast %c32_i32_222 : i32 to vector<8x256xi32>
    %346 = arith.cmpi sge, %0, %345 : vector<8x256xi32>
    %c14_i32_223 = arith.constant 14 : i32
    %347 = vector.broadcast %c14_i32_223 : i32 to vector<8x256xi32>
    %348 = arith.cmpi slt, %16, %347 : vector<8x256xi32>
    %349 = arith.andi %346, %348 : vector<8x256xi1>
    %cst_224 = arith.constant 0.000000e+00 : f32
    %350 = vector.broadcast %cst_224 : f32 to vector<8x256xf32>
    %351 = arith.select %349, %344, %350 : vector<8x256xi1>, vector<8x256xf32>
    %c88_225 = arith.constant 88 : index
    %c0_226 = arith.constant 0 : index
    %352 = vector.load %arg10[%c88_225, %c0_226] : memref<216x256xf32, #tpu.memory_space<vmem>>, vector<8x256xf32>
    tpu.vector_store %arg10[%c88_225, %c0_226], %351 {strides = array<i32>} : memref<216x256xf32, #tpu.memory_space<vmem>>, vector<8x256xf32>,
    %c2_i32_227 = arith.constant 2 : i32
    %353 = tpu.dynamic_rotate %328 by %c2_i32_227 dim 1 : vector<8x256xf32>, i32 -> vector<8x256xf32>
    %c2_i32_228 = arith.constant 2 : i32
    %354 = vector.broadcast %c2_i32_228 : i32 to vector<8x256xi32>
    %355 = arith.cmpi sge, %16, %354 : vector<8x256xi32>
    %cst_229 = arith.constant 0.000000e+00 : f32
    %356 = vector.broadcast %cst_229 : f32 to vector<8x256xf32>
    %357 = arith.select %355, %353, %356 : vector<8x256xi1>, vector<8x256xf32>
    %c96_230 = arith.constant 96 : index
    %c0_231 = arith.constant 0 : index
    %358 = vector.load %arg10[%c96_230, %c0_231] : memref<216x256xf32, #tpu.memory_space<vmem>>, vector<8x256xf32>
    tpu.vector_store %arg10[%c96_230, %c0_231], %357 {strides = array<i32>} : memref<216x256xf32, #tpu.memory_space<vmem>>, vector<8x256xf32>,
    %c104_232 = arith.constant 104 : index
    %c0_233 = arith.constant 0 : index
    %359 = vector.load %arg10[%c104_232, %c0_233] : memref<216x256xf32, #tpu.memory_space<vmem>>, vector<8x256xf32>
    tpu.vector_store %arg10[%c104_232, %c0_233], %328 {strides = array<i32>} : memref<216x256xf32, #tpu.memory_space<vmem>>, vector<8x256xf32>,
    %c254_i32_234 = arith.constant 254 : i32
    %360 = tpu.dynamic_rotate %328 by %c254_i32_234 dim 1 : vector<8x256xf32>, i32 -> vector<8x256xf32>
    %c14_i32_235 = arith.constant 14 : i32
    %361 = vector.broadcast %c14_i32_235 : i32 to vector<8x256xi32>
    %362 = arith.cmpi slt, %16, %361 : vector<8x256xi32>
    %cst_236 = arith.constant 0.000000e+00 : f32
    %363 = vector.broadcast %cst_236 : f32 to vector<8x256xf32>
    %364 = arith.select %362, %360, %363 : vector<8x256xi1>, vector<8x256xf32>
    %c112_237 = arith.constant 112 : index
    %c0_238 = arith.constant 0 : index
    %365 = vector.load %arg10[%c112_237, %c0_238] : memref<216x256xf32, #tpu.memory_space<vmem>>, vector<8x256xf32>
    tpu.vector_store %arg10[%c112_237, %c0_238], %364 {strides = array<i32>} : memref<216x256xf32, #tpu.memory_space<vmem>>, vector<8x256xf32>,
    %c226_i32_239 = arith.constant 226 : i32
    %366 = tpu.dynamic_rotate %328 by %c226_i32_239 dim 1 : vector<8x256xf32>, i32 -> vector<8x256xf32>
    %c224_i32_240 = arith.constant 224 : i32
    %367 = vector.broadcast %c224_i32_240 : i32 to vector<8x256xi32>
    %368 = arith.cmpi slt, %0, %367 : vector<8x256xi32>
    %c2_i32_241 = arith.constant 2 : i32
    %369 = vector.broadcast %c2_i32_241 : i32 to vector<8x256xi32>
    %370 = arith.cmpi sge, %16, %369 : vector<8x256xi32>
    %371 = arith.andi %368, %370 : vector<8x256xi1>
    %cst_242 = arith.constant 0.000000e+00 : f32
    %372 = vector.broadcast %cst_242 : f32 to vector<8x256xf32>
    %373 = arith.select %371, %366, %372 : vector<8x256xi1>, vector<8x256xf32>
    %c120_243 = arith.constant 120 : index
    %c0_244 = arith.constant 0 : index
    %374 = vector.load %arg10[%c120_243, %c0_244] : memref<216x256xf32, #tpu.memory_space<vmem>>, vector<8x256xf32>
    tpu.vector_store %arg10[%c120_243, %c0_244], %373 {strides = array<i32>} : memref<216x256xf32, #tpu.memory_space<vmem>>, vector<8x256xf32>,
    %c224_i32_245 = arith.constant 224 : i32
    %375 = tpu.dynamic_rotate %328 by %c224_i32_245 dim 1 : vector<8x256xf32>, i32 -> vector<8x256xf32>
    %c224_i32_246 = arith.constant 224 : i32
    %376 = vector.broadcast %c224_i32_246 : i32 to vector<8x256xi32>
    %377 = arith.cmpi slt, %0, %376 : vector<8x256xi32>
    %cst_247 = arith.constant 0.000000e+00 : f32
    %378 = vector.broadcast %cst_247 : f32 to vector<8x256xf32>
    %379 = arith.select %377, %375, %378 : vector<8x256xi1>, vector<8x256xf32>
    %c128_248 = arith.constant 128 : index
    %c0_249 = arith.constant 0 : index
    %380 = vector.load %arg10[%c128_248, %c0_249] : memref<216x256xf32, #tpu.memory_space<vmem>>, vector<8x256xf32>
    tpu.vector_store %arg10[%c128_248, %c0_249], %379 {strides = array<i32>} : memref<216x256xf32, #tpu.memory_space<vmem>>, vector<8x256xf32>,
    %c222_i32_250 = arith.constant 222 : i32
    %381 = tpu.dynamic_rotate %328 by %c222_i32_250 dim 1 : vector<8x256xf32>, i32 -> vector<8x256xf32>
    %c224_i32_251 = arith.constant 224 : i32
    %382 = vector.broadcast %c224_i32_251 : i32 to vector<8x256xi32>
    %383 = arith.cmpi slt, %0, %382 : vector<8x256xi32>
    %c14_i32_252 = arith.constant 14 : i32
    %384 = vector.broadcast %c14_i32_252 : i32 to vector<8x256xi32>
    %385 = arith.cmpi slt, %16, %384 : vector<8x256xi32>
    %386 = arith.andi %383, %385 : vector<8x256xi1>
    %cst_253 = arith.constant 0.000000e+00 : f32
    %387 = vector.broadcast %cst_253 : f32 to vector<8x256xf32>
    %388 = arith.select %386, %381, %387 : vector<8x256xi1>, vector<8x256xf32>
    %c136_254 = arith.constant 136 : index
    %c0_255 = arith.constant 0 : index
    %389 = vector.load %arg10[%c136_254, %c0_255] : memref<216x256xf32, #tpu.memory_space<vmem>>, vector<8x256xf32>
    tpu.vector_store %arg10[%c136_254, %c0_255], %388 {strides = array<i32>} : memref<216x256xf32, #tpu.memory_space<vmem>>, vector<8x256xf32>,
    %c40_256 = arith.constant 40 : index
    %c0_257 = arith.constant 0 : index
    %390 = vector.load %arg4[%c40_256, %c0_257] : memref<48x1xf32, #tpu.memory_space<vmem>>, vector<8x1xf32>
    %391 = vector.broadcast %390 : vector<8x1xf32> to vector<8x256xf32>
    %392 = arith.mulf %248, %391 : vector<8x256xf32>
    %c40_258 = arith.constant 40 : index
    %c0_259 = arith.constant 0 : index
    %393 = vector.load %arg5[%c40_258, %c0_259] : memref<48x1xf32, #tpu.memory_space<vmem>>, vector<8x1xf32>
    %394 = vector.broadcast %393 : vector<8x1xf32> to vector<8x256xf32>
    %395 = arith.addf %392, %394 : vector<8x256xf32>
    %cst_260 = arith.constant 0.000000e+00 : f32
    %396 = vector.broadcast %cst_260 : f32 to vector<8x256xf32>
    %397 = arith.maximumf %395, %396 : vector<8x256xf32>
    %c68_i32 = arith.constant 68 : i32
    %398 = tpu.dynamic_rotate %397 by %c68_i32 dim 1 : vector<8x256xf32>, i32 -> vector<8x256xf32>
    %c64_i32 = arith.constant 64 : i32
    %399 = vector.broadcast %c64_i32 : i32 to vector<8x256xi32>
    %400 = arith.cmpi sge, %0, %399 : vector<8x256xi32>
    %c4_i32 = arith.constant 4 : i32
    %401 = vector.broadcast %c4_i32 : i32 to vector<8x256xi32>
    %402 = arith.cmpi sge, %16, %401 : vector<8x256xi32>
    %403 = arith.andi %400, %402 : vector<8x256xi1>
    %cst_261 = arith.constant 0.000000e+00 : f32
    %404 = vector.broadcast %cst_261 : f32 to vector<8x256xf32>
    %405 = arith.select %403, %398, %404 : vector<8x256xi1>, vector<8x256xf32>
    %c144 = arith.constant 144 : index
    %c0_262 = arith.constant 0 : index
    %406 = vector.load %arg10[%c144, %c0_262] : memref<216x256xf32, #tpu.memory_space<vmem>>, vector<8x256xf32>
    tpu.vector_store %arg10[%c144, %c0_262], %405 {strides = array<i32>} : memref<216x256xf32, #tpu.memory_space<vmem>>, vector<8x256xf32>,
    %c64_i32_263 = arith.constant 64 : i32
    %407 = tpu.dynamic_rotate %397 by %c64_i32_263 dim 1 : vector<8x256xf32>, i32 -> vector<8x256xf32>
    %c64_i32_264 = arith.constant 64 : i32
    %408 = vector.broadcast %c64_i32_264 : i32 to vector<8x256xi32>
    %409 = arith.cmpi sge, %0, %408 : vector<8x256xi32>
    %cst_265 = arith.constant 0.000000e+00 : f32
    %410 = vector.broadcast %cst_265 : f32 to vector<8x256xf32>
    %411 = arith.select %409, %407, %410 : vector<8x256xi1>, vector<8x256xf32>
    %c152 = arith.constant 152 : index
    %c0_266 = arith.constant 0 : index
    %412 = vector.load %arg10[%c152, %c0_266] : memref<216x256xf32, #tpu.memory_space<vmem>>, vector<8x256xf32>
    tpu.vector_store %arg10[%c152, %c0_266], %411 {strides = array<i32>} : memref<216x256xf32, #tpu.memory_space<vmem>>, vector<8x256xf32>,
    %c60_i32 = arith.constant 60 : i32
    %413 = tpu.dynamic_rotate %397 by %c60_i32 dim 1 : vector<8x256xf32>, i32 -> vector<8x256xf32>
    %c64_i32_267 = arith.constant 64 : i32
    %414 = vector.broadcast %c64_i32_267 : i32 to vector<8x256xi32>
    %415 = arith.cmpi sge, %0, %414 : vector<8x256xi32>
    %c12_i32 = arith.constant 12 : i32
    %416 = vector.broadcast %c12_i32 : i32 to vector<8x256xi32>
    %417 = arith.cmpi slt, %16, %416 : vector<8x256xi32>
    %418 = arith.andi %415, %417 : vector<8x256xi1>
    %cst_268 = arith.constant 0.000000e+00 : f32
    %419 = vector.broadcast %cst_268 : f32 to vector<8x256xf32>
    %420 = arith.select %418, %413, %419 : vector<8x256xi1>, vector<8x256xf32>
    %c160 = arith.constant 160 : index
    %c0_269 = arith.constant 0 : index
    %421 = vector.load %arg10[%c160, %c0_269] : memref<216x256xf32, #tpu.memory_space<vmem>>, vector<8x256xf32>
    tpu.vector_store %arg10[%c160, %c0_269], %420 {strides = array<i32>} : memref<216x256xf32, #tpu.memory_space<vmem>>, vector<8x256xf32>,
    %c4_i32_270 = arith.constant 4 : i32
    %422 = tpu.dynamic_rotate %397 by %c4_i32_270 dim 1 : vector<8x256xf32>, i32 -> vector<8x256xf32>
    %c4_i32_271 = arith.constant 4 : i32
    %423 = vector.broadcast %c4_i32_271 : i32 to vector<8x256xi32>
    %424 = arith.cmpi sge, %16, %423 : vector<8x256xi32>
    %cst_272 = arith.constant 0.000000e+00 : f32
    %425 = vector.broadcast %cst_272 : f32 to vector<8x256xf32>
    %426 = arith.select %424, %422, %425 : vector<8x256xi1>, vector<8x256xf32>
    %c168 = arith.constant 168 : index
    %c0_273 = arith.constant 0 : index
    %427 = vector.load %arg10[%c168, %c0_273] : memref<216x256xf32, #tpu.memory_space<vmem>>, vector<8x256xf32>
    tpu.vector_store %arg10[%c168, %c0_273], %426 {strides = array<i32>} : memref<216x256xf32, #tpu.memory_space<vmem>>, vector<8x256xf32>,
    %c176 = arith.constant 176 : index
    %c0_274 = arith.constant 0 : index
    %428 = vector.load %arg10[%c176, %c0_274] : memref<216x256xf32, #tpu.memory_space<vmem>>, vector<8x256xf32>
    tpu.vector_store %arg10[%c176, %c0_274], %397 {strides = array<i32>} : memref<216x256xf32, #tpu.memory_space<vmem>>, vector<8x256xf32>,
    %c252_i32 = arith.constant 252 : i32
    %429 = tpu.dynamic_rotate %397 by %c252_i32 dim 1 : vector<8x256xf32>, i32 -> vector<8x256xf32>
    %c12_i32_275 = arith.constant 12 : i32
    %430 = vector.broadcast %c12_i32_275 : i32 to vector<8x256xi32>
    %431 = arith.cmpi slt, %16, %430 : vector<8x256xi32>
    %cst_276 = arith.constant 0.000000e+00 : f32
    %432 = vector.broadcast %cst_276 : f32 to vector<8x256xf32>
    %433 = arith.select %431, %429, %432 : vector<8x256xi1>, vector<8x256xf32>
    %c184 = arith.constant 184 : index
    %c0_277 = arith.constant 0 : index
    %434 = vector.load %arg10[%c184, %c0_277] : memref<216x256xf32, #tpu.memory_space<vmem>>, vector<8x256xf32>
    tpu.vector_store %arg10[%c184, %c0_277], %433 {strides = array<i32>} : memref<216x256xf32, #tpu.memory_space<vmem>>, vector<8x256xf32>,
    %c196_i32 = arith.constant 196 : i32
    %435 = tpu.dynamic_rotate %397 by %c196_i32 dim 1 : vector<8x256xf32>, i32 -> vector<8x256xf32>
    %c192_i32 = arith.constant 192 : i32
    %436 = vector.broadcast %c192_i32 : i32 to vector<8x256xi32>
    %437 = arith.cmpi slt, %0, %436 : vector<8x256xi32>
    %c4_i32_278 = arith.constant 4 : i32
    %438 = vector.broadcast %c4_i32_278 : i32 to vector<8x256xi32>
    %439 = arith.cmpi sge, %16, %438 : vector<8x256xi32>
    %440 = arith.andi %437, %439 : vector<8x256xi1>
    %cst_279 = arith.constant 0.000000e+00 : f32
    %441 = vector.broadcast %cst_279 : f32 to vector<8x256xf32>
    %442 = arith.select %440, %435, %441 : vector<8x256xi1>, vector<8x256xf32>
    %c192 = arith.constant 192 : index
    %c0_280 = arith.constant 0 : index
    %443 = vector.load %arg10[%c192, %c0_280] : memref<216x256xf32, #tpu.memory_space<vmem>>, vector<8x256xf32>
    tpu.vector_store %arg10[%c192, %c0_280], %442 {strides = array<i32>} : memref<216x256xf32, #tpu.memory_space<vmem>>, vector<8x256xf32>,
    %c192_i32_281 = arith.constant 192 : i32
    %444 = tpu.dynamic_rotate %397 by %c192_i32_281 dim 1 : vector<8x256xf32>, i32 -> vector<8x256xf32>
    %c192_i32_282 = arith.constant 192 : i32
    %445 = vector.broadcast %c192_i32_282 : i32 to vector<8x256xi32>
    %446 = arith.cmpi slt, %0, %445 : vector<8x256xi32>
    %cst_283 = arith.constant 0.000000e+00 : f32
    %447 = vector.broadcast %cst_283 : f32 to vector<8x256xf32>
    %448 = arith.select %446, %444, %447 : vector<8x256xi1>, vector<8x256xf32>
    %c200 = arith.constant 200 : index
    %c0_284 = arith.constant 0 : index
    %449 = vector.load %arg10[%c200, %c0_284] : memref<216x256xf32, #tpu.memory_space<vmem>>, vector<8x256xf32>
    tpu.vector_store %arg10[%c200, %c0_284], %448 {strides = array<i32>} : memref<216x256xf32, #tpu.memory_space<vmem>>, vector<8x256xf32>,
    %c188_i32 = arith.constant 188 : i32
    %450 = tpu.dynamic_rotate %397 by %c188_i32 dim 1 : vector<8x256xf32>, i32 -> vector<8x256xf32>
    %c192_i32_285 = arith.constant 192 : i32
    %451 = vector.broadcast %c192_i32_285 : i32 to vector<8x256xi32>
    %452 = arith.cmpi slt, %0, %451 : vector<8x256xi32>
    %c12_i32_286 = arith.constant 12 : i32
    %453 = vector.broadcast %c12_i32_286 : i32 to vector<8x256xi32>
    %454 = arith.cmpi slt, %16, %453 : vector<8x256xi32>
    %455 = arith.andi %452, %454 : vector<8x256xi1>
    %cst_287 = arith.constant 0.000000e+00 : f32
    %456 = vector.broadcast %cst_287 : f32 to vector<8x256xf32>
    %457 = arith.select %455, %450, %456 : vector<8x256xi1>, vector<8x256xf32>
    %c208 = arith.constant 208 : index
    %c0_288 = arith.constant 0 : index
    %458 = vector.load %arg10[%c208, %c0_288] : memref<216x256xf32, #tpu.memory_space<vmem>>, vector<8x256xf32>
    tpu.vector_store %arg10[%c208, %c0_288], %457 {strides = array<i32>} : memref<216x256xf32, #tpu.memory_space<vmem>>, vector<8x256xf32>,
    %c0_289 = arith.constant 0 : index
    %c0_290 = arith.constant 0 : index
    %459 = vector.load %arg8[%c0_289, %c0_290] : memref<8x216xf32, #tpu.memory_space<vmem>>, vector<8x216xf32>
    %c0_291 = arith.constant 0 : index
    %c0_292 = arith.constant 0 : index
    %460 = vector.load %arg10[%c0_291, %c0_292] : memref<216x256xf32, #tpu.memory_space<vmem>>, vector<216x256xf32>
    %cst_293 = arith.constant dense<0.000000e+00> : vector<8x256xf32>
    %461 = tpu.matmul %459, %460, %cst_293 {dimension_numbers = #tpu.dot_dimension_numbers<[1], [0], [0], [1], [0, 0, 1, 1], [], []>} : vector<8x216xf32>, vector<216x256xf32>, vector<8x256xf32> -> vector<8x256xf32>
    %c24_294 = arith.constant 24 : index
    %c0_295 = arith.constant 0 : index
    %462 = vector.load %arg3[%c24_294, %c0_295] : memref<32x1xf32, #tpu.memory_space<vmem>>, vector<8x1xf32>
    %463 = vector.broadcast %462 : vector<8x1xf32> to vector<8x256xf32>
    %464 = arith.addf %461, %463 : vector<8x256xf32>
    %c0_296 = arith.constant 0 : index
    %c3 = arith.constant 3 : index
    %c0_297 = arith.constant 0 : index
    %c0_298 = arith.constant 0 : index
    %465 = vector.load %arg9[%c0_296, %c3, %c0_297, %c0_298] : memref<1x4x8x256xf32, #tpu.memory_space<vmem>>, vector<1x1x8x256xf32>
    %466 = vector.shape_cast %465 : vector<1x1x8x256xf32> to vector<8x256xf32>
    %467 = vector.shape_cast %464 : vector<8x256xf32> to vector<1x1x8x256xf32>
    tpu.vector_store %arg9[%c0_296, %c3, %c0_297, %c0_298], %467 {strides = array<i32>} : memref<1x4x8x256xf32, #tpu.memory_space<vmem>>, vector<1x1x8x256xf32>,
    return
  }
  func.func @transform_0(%arg0: i32) -> (i32, i32, i32) {
    %c0_i32 = arith.constant 0 : i32
    %c0_i32_0 = arith.constant 0 : i32
    %c0_i32_1 = arith.constant 0 : i32
    return %arg0, %c0_i32, %c0_i32_0 : i32, i32, i32
  }
  func.func @transform_1(%arg0: i32) -> (i32, i32) {
    %c0_i32 = arith.constant 0 : i32
    %c0_i32_0 = arith.constant 0 : i32
    %c0_i32_1 = arith.constant 0 : i32
    return %c0_i32, %c0_i32_0 : i32, i32
  }
  func.func @transform_2(%arg0: i32) -> (i32, i32) {
    %c0_i32 = arith.constant 0 : i32
    %c0_i32_0 = arith.constant 0 : i32
    %c0_i32_1 = arith.constant 0 : i32
    return %c0_i32, %c0_i32_0 : i32, i32
  }
  func.func @transform_3(%arg0: i32) -> (i32, i32) {
    %c0_i32 = arith.constant 0 : i32
    %c0_i32_0 = arith.constant 0 : i32
    %c0_i32_1 = arith.constant 0 : i32
    return %c0_i32, %c0_i32_0 : i32, i32
  }
  func.func @transform_4(%arg0: i32) -> (i32, i32) {
    %c0_i32 = arith.constant 0 : i32
    %c0_i32_0 = arith.constant 0 : i32
    %c0_i32_1 = arith.constant 0 : i32
    return %c0_i32, %c0_i32_0 : i32, i32
  }
  func.func @transform_5(%arg0: i32) -> (i32, i32) {
    %c0_i32 = arith.constant 0 : i32
    %c0_i32_0 = arith.constant 0 : i32
    %c0_i32_1 = arith.constant 0 : i32
    return %c0_i32, %c0_i32_0 : i32, i32
  }
  func.func @transform_6(%arg0: i32) -> (i32, i32) {
    %c0_i32 = arith.constant 0 : i32
    %c0_i32_0 = arith.constant 0 : i32
    %c0_i32_1 = arith.constant 0 : i32
    return %c0_i32, %c0_i32_0 : i32, i32
  }
  func.func @transform_7(%arg0: i32) -> (i32, i32) {
    %c0_i32 = arith.constant 0 : i32
    %c0_i32_0 = arith.constant 0 : i32
    %c0_i32_1 = arith.constant 0 : i32
    return %c0_i32, %c0_i32_0 : i32, i32
  }
  func.func @transform_8(%arg0: i32) -> (i32, i32, i32, i32) {
    %c0_i32 = arith.constant 0 : i32
    %c0_i32_0 = arith.constant 0 : i32
    %c0_i32_1 = arith.constant 0 : i32
    %c0_i32_2 = arith.constant 0 : i32
    return %arg0, %c0_i32, %c0_i32_0, %c0_i32_1 : i32, i32, i32, i32
  }
}

</mosaic_0001>

<bundles_post_ra>
// kernel: d2block_forward.1
= control target key start
LH: loop header
LB: loop body
LE: loop exit
PB: predicated region body
PF: predicated region fallthrough
CT: control target
= control target key end

     0   :  { %s2093_s27 = smov 0   ;;  %s2858_s0 = inlined_call_operand.vmem [shape: f32[2,32,256], index: 0, kind: input, shape index: {}]   ;;  %s2859_s1 = inlined_call_operand.vmem [shape: f32[8,32], index: 1, kind: input, shape index: {}]   ;;  %s2860_s2 = inlined_call_operand.vmem [shape: f32[32,1], index: 2, kind: input, shape index: {}]   ;;  %s2861_s3 = inlined_call_operand.vmem [shape: f32[48,1], index: 3, kind: input, shape index: {}]   ;;  %s2862_s4 = inlined_call_operand.vmem [shape: f32[48,1], index: 4, kind: input, shape index: {}]   ;;  %s2863_s5 = inlined_call_operand.vmem [shape: f32[8,72], index: 5, kind: input, shape index: {}]   ;;  %s2864_s6 = inlined_call_operand.vmem [shape: f32[8,144], index: 6, kind: input, shape index: {}]   ;;  %s2865_s7 = inlined_call_operand.vmem [shape: f32[8,216], index: 7, kind: input, shape index: {}]   ;;  %s2866_s8 = inlined_call_operand.vmem [shape: f32[2,4,8,256], index: 8, kind: output, shape index: {}]  }
   0x1 LB: > { %s1496_s28 = sadd.s32 4294967295, %s2022_s27   ;;  %p1500_p0 = scmp.ge.s32.totalorder %s2022_s27, 1  ;;  %s2022_s27 = sphi %s2093_s27, %s18_s27  }
   0x2   : > { %p262_p1 = scmp.lt.s32.totalorder %s2022_s27, 3 }
   0x4   : > { %p263_p2 = pnand %p1500_p0, %p262_p1 }
   0x5   : > { %p296_p3 = scmp.lt.s32.totalorder (!%p263_p2), %s1496_s28, 1  ;;  %v342_v0 = vld [vmem:[%s2860_s2] sm:$0xff] (!%p263_p2)  ;;  %v2024_v1 = vmov (!%p263_p2), 0.0   ;;  %v2025_v2 = vmov (!%p263_p2), 0   ;;  %vm348_vm0 = vcmask (!%p263_p2), 261120   ;;  %s2026_s22 = smov (!%p263_p2), 16   ;;  %v306_v37 = vlaneseq (!%p263_p2) }
   0x6   : > { %266 = sbr.rel (%p263_p2) target bundleno = 1330 (0x532), region = 52  ;;  %416 = vmatprep.mubr.f32.mxu0 (!%p263_p2), %v2024_v1  ;;  %1799 = vset.pattern.permute.xlu0 (!%p263_p2), %v2025_v2  ;;  %v433_v3 = vld [vmem:[%s2862_s4] sm:$0xff] (!%p263_p2)  ;;  %s2027_s23 = smov (!%p263_p2), 17   ;;  %v652_v32 = vld [vmem:[%s2861_s3 + $0x8] sm:$0xff] (!%p263_p2)  ;;  %v760_v35 = vld [vmem:[%s2862_s4 + $0x10] sm:$0xff] (!%p263_p2)  ;;  %vm2873_vm9 = vmmov (!%p263_p2), 1  }
   0x7   : > { %345 = vperm.xlu0 (!%p263_p2), %1799, %v342_v0   ;;  %1800 = vset.pattern.permute.xlu1 (!%p263_p2), %v2025_v2  ;;  %v425_v4 = vld [vmem:[%s2861_s3] sm:$0xff] (!%p263_p2)  ;;  %s2028_s24 = smov (!%p263_p2), 1   ;;  %s2029_s25 = smov (!%p263_p2), 15   ;;  %v568_v33 = vld [vmem:[%s2860_s2 + $0x8] sm:$0xff] (!%p263_p2)  ;;  %v752_v36 = vld [vmem:[%s2861_s3 + $0x10] sm:$0xff] (!%p263_p2)  ;;  %v2166_v38 = vand.u32 (!%p263_p2), 127, %v306_v37 }
   0x8   : > { %436 = vperm.xlu1 (!%p263_p2), %1800, %v433_v3   ;;  %v333_v17 = vld [vmem:[%s2859_s1] sm:$0xff] (!%p263_p2)  ;;  %s2030_s26 = smov (!%p263_p2), 113   ;;  %s2032_s29 = smov (!%p263_p2), 111   ;;  %v660_v34 = vld [vmem:[%s2862_s4 + $0x8] sm:$0xff] (!%p263_p2) }
   0x9   : > { %s2033_s30 = smov (!%p263_p2), 112   ;;  %v2169_v39 = vadd.s32 (!%p263_p2), 128, %v2166_v38  ;;  %v2172_v40 = vand.u32 (!%p263_p2), 15, %v2166_v38  ;;  %vm450_vm1 = vcmp.ge.s32.totalorder (!%p263_p2), %v2166_v38, 16  ;;  %vm2871_vm3 = vcmp.lt.s32.totalorder (!%p263_p2), %v2166_v38, 16  ;;  %s2035_s9 = smov (!%p263_p2), 32  }
   0xa   : > { %vm2869_vm4 = vcmp.lt.s32.totalorder (!%p263_p2), %v2166_v38, 17  ;;  %vm2868_vm7 = vcmp.lt.s32.totalorder (!%p263_p2), %v2166_v38, 1  ;;  %vm2867_vm11 = vcmp.lt.s32.totalorder (!%p263_p2), %v2166_v38, 15  ;;  %s2036_s10 = smov (!%p263_p2), 34   ;;  %s2878_s11 = smov (!%p263_p2), 2  }
   0xb   : > { %428 = vperm.xlu0 (!%p263_p2), %1799, %v425_v4   ;;  %v2175_v41 = vand.u32 (!%p263_p2), 15, %v2169_v39  ;;  %vm452_vm2 = vcmp.ge.s32.totalorder (!%p263_p2), %v2172_v40, 1  ;;  %vm2882_vm8 = vcmp.lt.s32.totalorder (!%p263_p2), %v2172_v40, 15  ;;  %s2876_s12 = smov (!%p263_p2), 30   ;;  %s2877_s14 = smov (!%p263_p2), 126  }
   0xc   : > { %vm454_vm6 = vmand (!%p263_p2), %vm450_vm1, %vm452_vm2  ;;  %s2880_s17 = smov (!%p263_p2), 94   ;;  %s2879_s18 = smov (!%p263_p2), 96  }
   0xd   : > { %s3031_s28 = smov (!%p296_p3, %s1496_s28), 1  ;;  %vm453_vm5 = vcmp.ge.s32.totalorder %v2175_v41, 1  ;;  %vm2206_vm12 = vmpackc.low %vm450_vm1, %vm454_vm6  ;;  %vm479_vm13 = vcmp.lt.s32.totalorder %v2175_v41, 15  ;;  %vm518_vm6 = vcmp.lt.s32.totalorder %v2169_v39, 240  ;;  %s2047_s15 = smov 124  }
   0xe   : > { %s1517_s13 = sshll.u32 %s3031_s28, 6  ;;  %s2031_s28 = smov 127   ;;  %vm2199_vm10 = vmpackc.low %vm2873_vm9, %vm453_vm5 }
   0xf   : > { %s300_s16 = scalar_lea.vmem %s2858_s0, %s1517_s13  ;;  %s2122_s21 = scalar_lea.vmem %s2866_s8, %s1517_s13  ;;  %vm480_vm14 = vmand %vm450_vm1, %vm2882_vm8 }
  0x10   : > { %v335_v5 = vld [vmem:[%s300_s16 + $0x8] sm:$0xff]  ;;  %v337_v6 = vld [vmem:[%s300_s16 + $0x18] sm:$0xff]  ;;  %v334_v7 = vld [vmem:[%s300_s16] sm:$0xff]  ;;  %s2875_s13 = smov 98  }
  0x11   : > { %v1603_v8 = vpack.c.bf16 %v337_v6, %v335_v5  ;;  %v336_v9 = vld [vmem:[%s300_s16 + $0x10] sm:$0xff]  ;;  %v339_v10 = vld [vmem:[%s300_s16 + $0x28] sm:$0xff]  ;;  %v341_v11 = vld [vmem:[%s300_s16 + $0x38] sm:$0xff] }
  0x12   : > { %v1605_v12 = vpack.c.bf16 %v336_v9, %v334_v7  ;;  %v1607_v13 = vpack.c.bf16 %v341_v11, %v339_v10  ;;  %v338_v14 = vld [vmem:[%s300_s16 + $0x20] sm:$0xff]  ;;  %v340_v15 = vld [vmem:[%s300_s16 + $0x30] sm:$0xff]  ;;  %vm2231_vm15 = vmpackc.low %vm453_vm5, %vm479_vm13 }
  0x13   : > { %1604 = vmatprep.subr.bf16.mxu0 %v1603_v8  ;;  %v1609_v16 = vpack.c.bf16 %v340_v15, %v338_v14  ;;  %vm2238_vm1 = vmpackc.low %vm452_vm2, %vm480_vm14  ;;  %v2906_v15 = vmov 0 }
  0x14   : > { %1606 = vmatpush1.bf16.msra.mxu0 %v1605_v12  ;;  %vm2261_vm14 = vmpackc.low %vm2882_vm8, %vm2873_vm9 }
  0x15   : > { %1608 = vmatprep.subr.bf16.mxu0 %v1607_v13  ;;  %v2907_v15 = vsel %vm2261_vm14, 4294967295, %v2906_v15 }
  0x18   : > { %1610 = vmatpush1.bf16.msra.mxu0 %v1609_v16 }
  0x1b   : > { %1505 = vmatmul.mubr.msk.f32.vlgmr.msra.gmra.mrb[0].mxu0 %vm348_vm0, %v333_v17  ;;  %vm2870_vm0 = vcmp.lt.s32.totalorder %v2166_v38, 127 }
  0x1c   : > { %642 = vmatprep.mubr.f32.mxu0 %v2024_v1 }
  0x86   : > { %v346_v18 = vpop.permute.xlu0 %345 }
  0x87   : > { %v437_v24 = vpop.permute.xlu1 %436 }
  0x8a   : > { %v429_v22 = vpop.permute.xlu0 %428 }
  0xee   : > { %v418_v19 = vpop.f32.mrb[0].mxu0 }
  0xef   : > { %v2124_v20 = vadd.f32 %v418_v19, %v346_v18  ;;  %v420_v21 = vpop.f32.mrb[1].mxu0 }
  0xf0   : > { %v2126_v23 = vadd.f32 %v420_v21, %v346_v18 }
  0xf1   : > { %423 = vst [vmem:[%s2122_s21] sm:$0xff] %v2124_v20  ;;  %v431_v25 = vmul.f32 %v429_v22, %v2124_v20 }
  0xf2   : > { %424 = vst [vmem:[%s2122_s21 + $0x8] sm:$0xff] %v2126_v23  ;;  %v432_v26 = vmul.f32 %v429_v22, %v2126_v23 }
  0xf3   : > { %v439_v27 = vadd.f32 %v437_v24, %v431_v25 }
  0xf4   : > { %v440_v28 = vadd.f32 %v437_v24, %v432_v26 }
  0xf5   : > { %v2134_v29 = vmax.f32 %v439_v27, 0.0  ;;  %v2908_v27 = vmov 0 }
  0xf6   : > { %v2136_v30 = vmax.f32 %v440_v28, 0.0 }
  0xf8   : > { %v1806_v31 = vpack.i.bf16 %v2136_v30, %v2134_v29 }
  0xfa   : > { %1807 = vrot.lane.b32.xlu0 %v1806_v31, %s2026_s22  ;;  %1802 = vrot.lane.b32.xlu1 %v1806_v31, %s2027_s23 }
  0xfe   : > { %1817 = vrot.lane.b32.xlu0 %v1806_v31, %s2028_s24  ;;  %1812 = vrot.lane.b32.xlu1 %v1806_v31, %s2029_s25 }
 0x102   : > { %1827 = vrot.lane.b32.xlu0 %v1806_v31, %s2030_s26  ;;  %1822 = vrot.lane.b32.xlu1 %v1806_v31, %s2031_s28 }
 0x106   : > { %536 = vrot.lane.b32.xlu0 %v2134_v29, %s2032_s29  ;;  %1832 = vrot.lane.b32.xlu1 %v1806_v31, %s2033_s30  ;;  %v2910_v31 = vmov 0 }
 0x10a   : > { %655 = vperm.xlu0 %1799, %v652_v32   ;;  %538 = vrot.lane.b32.xlu1 %v2136_v30, %s2032_s29 }
 0x10e   : > { %571 = vperm.xlu0 %1799, %v568_v33   ;;  %663 = vperm.xlu1 %1800, %v660_v34  }
 0x112   : > { %763 = vperm.xlu0 %1799, %v760_v35   ;;  %755 = vperm.xlu1 %1800, %v752_v36   ;;  %v549_v35 = vld [vmem:[%s2863_s5] sm:$0xff] }
 0x16c   : > { %v1808_v42 = vpop.permute.xlu0 %1807  ;;  %v1803_v43 = vpop.permute.xlu1 %1802 }
 0x16d   : > { %v1810_v44 = vunpack.i.h.bf16 %v1808_v42  ;;  %v1809_v45 = vunpack.i.l.bf16 %v1808_v42  ;;  %v1805_v46 = vunpack.i.h.bf16 %v1803_v43  ;;  %v1804_v47 = vunpack.i.l.bf16 %v1803_v43 }
 0x16f   : > { %v465_v48 = vsel %vm2871_vm3, %v1809_v45, %v1810_v44  ;;  %v466_v49 = vsel %vm2871_vm3, %v1810_v44, %v1809_v45  ;;  %v448_v50 = vsel %vm2869_vm4, %v1804_v47, %v1805_v46  ;;  %v449_v51 = vsel %vm2869_vm4, %v1805_v46, %v1804_v47 }
 0x170   : > { %v1611_v53 = vpack.c.bf16 %v465_v48, %v448_v50  ;;  %v1614_v54 = vpack.c.bf16 %v466_v49, %v449_v51  ;;  %v1818_v55 = vpop.permute.xlu0 %1817  ;;  %v1813_v56 = vpop.permute.xlu1 %1812  ;;  %vm2881_vm4 = vcmp.lt.s32.totalorder %v2166_v38, 112  ;;  %vm2886_vm3 = vcmp.lt.s32.totalorder %v2166_v38, 111 }
 0x171   : > { %v1820_v58 = vunpack.i.h.bf16 %v1818_v55  ;;  %v1819_v59 = vunpack.i.l.bf16 %v1818_v55  ;;  %v1815_v60 = vunpack.i.h.bf16 %v1813_v56  ;;  %v1814_v61 = vunpack.i.l.bf16 %v1813_v56 }
 0x172   : > { %1613 = vmatprep.subr.msk.bf16.mxu0 %vm2199_vm10, %v1611_v53 }
 0x173   : > { %v491_v62 = vsel %vm2868_vm7, %v1819_v59, %v1820_v58  ;;  %v492_v63 = vsel %vm2868_vm7, %v1820_v58, %v1819_v59  ;;  %v476_v0 = vsel %vm2867_vm11, %v1814_v61, %v1815_v60  ;;  %v477_v1 = vsel %vm2867_vm11, %v1815_v60, %v1814_v61  ;;  %1616 = vmatpush1.bf16.msk.msra.mxu0 %vm2206_vm12, %v1614_v54  ;;  %vm2248_vm11 = vmpackc.low %vm479_vm13, %vm2873_vm9 }
 0x174   : > { %v1617_v3 = vpack.c.bf16 %v491_v62, %v476_v0  ;;  %v1620_v4 = vpack.c.bf16 %v492_v63, %v477_v1  ;;  %v1828_v5 = vpop.permute.xlu0 %1827  ;;  %v1823_v6 = vpop.permute.xlu1 %1822  ;;  %vm2872_vm7 = vcmp.lt.s32.totalorder %v2166_v38, 113 }
 0x175   : > { %v1825_v8 = vunpack.i.h.bf16 %v1823_v6  ;;  %v1824_v9 = vunpack.i.l.bf16 %v1823_v6  ;;  %v1830_v11 = vunpack.i.h.bf16 %v1828_v5  ;;  %v1829_v12 = vunpack.i.l.bf16 %v1828_v5 }
 0x176   : > { %1619 = vmatprep.subr.msk.bf16.mxu0 %vm2231_vm15, %v1617_v3 }
 0x177   : > { %v504_v13 = vsel %vm2870_vm0, %v1824_v9, %v1825_v8  ;;  %v505_v14 = vsel %vm2870_vm0, %v1825_v8, %v1824_v9  ;;  %1622 = vmatpush1.bf16.msk.msra.mxu0 %vm2238_vm1, %v1620_v4  ;;  %vm520_vm0 = vmand %vm518_vm6, %vm453_vm5  ;;  %v515_v22 = vsel %vm2872_vm7, %v1829_v12, %v1830_v11  ;;  %v516_v24 = vsel %vm2872_vm7, %v1830_v11, %v1829_v12 }
 0x178   : > { %v1623_v16 = vpack.c.bf16 %v505_v14, %v2136_v30  ;;  %v1626_v17 = vpack.c.bf16 %v504_v13, %v2134_v29  ;;  %v1833_v18 = vpop.permute.xlu1 %1832  ;;  %vm2287_vm5 = vmpackc.low %vm518_vm6, %vm520_vm0  ;;  %v537_v33 = vpop.permute.xlu0 %536 }
 0x179   : > { %v1835_v19 = vunpack.i.h.bf16 %v1833_v18  ;;  %v1834_v21 = vunpack.i.l.bf16 %v1833_v18  ;;  %v2909_v27 = vsel %vm2287_vm5, 4294967295, %v2908_v27  ;;  %vm2295_vm7 = vmpackc.low %vm2873_vm9, %vm452_vm2  ;;  %vm574_vm2 = vcmask 588800  }
 0x17a   : > { %1625 = vmatprep.subr.msk.bf16.mxu0 %vm2248_vm11, %v1623_v16  ;;  %v2911_v31 = vsel %vm2295_vm7, 4294967295, %v2910_v31  ;;  %vm2303_vm0 = vmand %vm518_vm6, %vm479_vm13  ;;  %vm2914_vm13 = vcmp.lt.s32.totalorder %v2166_v38, 16 }
 0x17b   : > { %v530_v25 = vsel %vm2881_vm4, %v1834_v21, %v1835_v19  ;;  %v531_v26 = vsel %vm2881_vm4, %v1835_v19, %v1834_v21  ;;  %1628 = vmatpush1.bf16.msk.msra.mxu0 %vm2261_vm14, %v1626_v17  ;;  %vm2915_vm6 = vmmov %vm2914_vm13 }
 0x17c   : > { %v1629_v28 = vpack.c.bf16 %v531_v26, %v516_v24  ;;  %v1632_v29 = vpack.c.bf16 %v530_v25, %v515_v22  ;;  %v539_v30 = vpop.permute.xlu1 %538 }
 0x17d   : > { %v542_v34 = vsel %vm2886_vm3, %v539_v30, %v537_v33  ;;  %v541_v36 = vsel %vm2886_vm3, %v537_v33, %v539_v30 }
 0x17e   : > { %1631 = vmatprep.subr.msk.bf16.mxu0 %vm2287_vm5, %v1629_v28 }
 0x17f   : > { %1634 = vmatpush1.bf16.msk.msra.mxu0 %vm2295_vm7, %v1632_v29 }
 0x180   : > { %1531 = vmatprep.subr.msk.mxu0 %vm2303_vm0, %v542_v34 }
 0x183   : > { %1532 = vmatpush1.msk.msra.mxu0 %vm2882_vm8, %v541_v36 }
 0x184   : > { %1506 = vmatmul.mubr.msk.f32.vlgmr.msra.gmra.mrb[2].mxu0 %vm574_vm2, %v549_v35  ;;  %vm2916_vm2 = vcmp.lt.s32.totalorder %v2166_v38, 17 }
 0x185   : > { %vm2917_vm9 = vmmov %vm2916_vm2 }
 0x189   : > { %v656_v37 = vpop.permute.xlu0 %655 }
 0x18a   : > { %v658_v42 = vmul.f32 %v656_v37, %v2124_v20  ;;  %v659_v43 = vmul.f32 %v656_v37, %v2126_v23 }
 0x18d   : > { %v664_v44 = vpop.permute.xlu1 %663  ;;  %v572_v50 = vpop.permute.xlu0 %571 }
 0x18e   : > { %v666_v45 = vadd.f32 %v664_v44, %v658_v42  ;;  %v667_v46 = vadd.f32 %v664_v44, %v659_v43 }
 0x190   : > { %v668_v47 = vmax.f32 %v666_v45, 0.0  ;;  %v669_v48 = vmax.f32 %v667_v46, 0.0 }
 0x191   : > { %v764_v51 = vpop.permute.xlu0 %763  ;;  %v756_v53 = vpop.permute.xlu1 %755 }
 0x192   : > { %v1841_v49 = vpack.i.bf16 %v669_v48, %v668_v47 }
 0x194   : > { %1842 = vrot.lane.b32.xlu0 %v1841_v49, %s2026_s22  ;;  %1837 = vrot.lane.b32.xlu1 %v1841_v49, %s2027_s23 }
 0x198   : > { %1852 = vrot.lane.b32.xlu0 %v1841_v49, %s2028_s24  ;;  %1847 = vrot.lane.b32.xlu1 %v1841_v49, %s2029_s25 }
 0x19c   : > { %1862 = vrot.lane.b32.xlu0 %v1841_v49, %s2030_s26  ;;  %1857 = vrot.lane.b32.xlu1 %v1841_v49, %s2031_s28 }
 0x1a0   : > { %1872 = vrot.lane.b32.xlu0 %v1841_v49, %s2032_s29  ;;  %1867 = vrot.lane.b32.xlu1 %v1841_v49, %s2033_s30 }
 0x206   : > { %v1843_v54 = vpop.permute.xlu0 %1842  ;;  %v1838_v55 = vpop.permute.xlu1 %1837 }
 0x207   : > { %v1845_v56 = vunpack.i.h.bf16 %v1843_v54  ;;  %v1844_v58 = vunpack.i.l.bf16 %v1843_v54  ;;  %v1840_v59 = vunpack.i.h.bf16 %v1838_v55  ;;  %v1839_v60 = vunpack.i.l.bf16 %v1838_v55 }
 0x209   : > { %v684_v61 = vsel %vm2914_vm13, %v1844_v58, %v1845_v56  ;;  %v685_v62 = vsel %vm2915_vm6, %v1845_v56, %v1844_v58  ;;  %v674_v63 = vsel %vm2916_vm2, %v1839_v60, %v1840_v59  ;;  %v675_v0 = vsel %vm2917_vm9, %v1840_v59, %v1839_v60 }
 0x20a   : > { %v1635_v1 = vpack.c.bf16 %v684_v61, %v674_v63  ;;  %v1638_v3 = vpack.c.bf16 %v685_v62, %v675_v0  ;;  %v1853_v4 = vpop.permute.xlu0 %1852  ;;  %v1848_v5 = vpop.permute.xlu1 %1847  ;;  %vm2918_vm13 = vcmp.lt.s32.totalorder %v2166_v38, 1  ;;  %vm2920_vm2 = vcmp.lt.s32.totalorder %v2166_v38, 15  ;;  %v998_v62 = vld [vmem:[%s2861_s3 + $0x18] sm:$0xff]  ;;  %v1106_v63 = vld [vmem:[%s2862_s4 + $0x20] sm:$0xff] }
 0x20b   : > { %v1855_v6 = vunpack.i.h.bf16 %v1853_v4  ;;  %v1854_v8 = vunpack.i.l.bf16 %v1853_v4  ;;  %v1850_v9 = vunpack.i.h.bf16 %v1848_v5  ;;  %v1849_v11 = vunpack.i.l.bf16 %v1848_v5  ;;  %vm2919_vm6 = vmmov %vm2918_vm13  ;;  %v1098_v0 = vld [vmem:[%s2861_s3 + $0x20] sm:$0xff]  ;;  %v1206_v4 = vld [vmem:[%s2862_s4 + $0x28] sm:$0xff] }
 0x20c   : > { %1637 = vmatprep.subr.msk.bf16.mxu0 %vm2199_vm10, %v1635_v1  ;;  %vm2921_vm9 = vmmov %vm2920_vm2  ;;  %v1198_v1 = vld [vmem:[%s2861_s3 + $0x28] sm:$0xff] }
 0x20d   : > { %v704_v12 = vsel %vm2918_vm13, %v1854_v8, %v1855_v6  ;;  %v705_v13 = vsel %vm2919_vm6, %v1855_v6, %v1854_v8  ;;  %v694_v14 = vsel %vm2920_vm2, %v1849_v11, %v1850_v9  ;;  %v695_v16 = vsel %vm2921_vm9, %v1850_v9, %v1849_v11  ;;  %1640 = vmatpush1.bf16.msk.msra.mxu0 %vm2206_vm12, %v1638_v3  ;;  %v914_v3 = vld [vmem:[%s2860_s2 + $0x10] sm:$0xff] }
 0x20e   : > { %v1641_v17 = vpack.c.bf16 %v704_v12, %v694_v14  ;;  %v1644_v18 = vpack.c.bf16 %v705_v13, %v695_v16  ;;  %v1863_v19 = vpop.permute.xlu0 %1862  ;;  %v1858_v21 = vpop.permute.xlu1 %1857  ;;  %vm2922_vm13 = vcmp.lt.s32.totalorder %v2166_v38, 127  ;;  %vm2924_vm2 = vcmp.lt.s32.totalorder %v2166_v38, 113 }
 0x20f   : > { %v1860_v22 = vunpack.i.h.bf16 %v1858_v21  ;;  %v1859_v24 = vunpack.i.l.bf16 %v1858_v21  ;;  %v1865_v25 = vunpack.i.h.bf16 %v1863_v19  ;;  %v1864_v26 = vunpack.i.l.bf16 %v1863_v19  ;;  %vm2923_vm6 = vmmov %vm2922_vm13 }
 0x210   : > { %1643 = vmatprep.subr.msk.bf16.mxu0 %vm2231_vm15, %v1641_v17  ;;  %vm2925_vm9 = vmmov %vm2924_vm2 }
 0x211   : > { %v716_v28 = vsel %vm2922_vm13, %v1859_v24, %v1860_v22  ;;  %v717_v29 = vsel %vm2923_vm6, %v1860_v22, %v1859_v24  ;;  %1646 = vmatpush1.bf16.msk.msra.mxu0 %vm2238_vm1, %v1644_v18  ;;  %v726_v37 = vsel %vm2924_vm2, %v1864_v26, %v1865_v25  ;;  %v727_v42 = vsel %vm2925_vm9, %v1865_v25, %v1864_v26 }
 0x212   : > { %v1647_v30 = vpack.c.bf16 %v717_v29, %v669_v48  ;;  %v1650_v33 = vpack.c.bf16 %v716_v28, %v668_v47  ;;  %v1868_v34 = vpop.permute.xlu1 %1867  ;;  %vm920_vm13 = vcmask 130048   ;;  %v1873_v5 = vpop.permute.xlu0 %1872  ;;  %vm2884_vm6 = vcmp.ge.s32.totalorder %v2166_v38, 32 }
 0x213   : > { %v1870_v35 = vunpack.i.h.bf16 %v1868_v34  ;;  %v1869_v36 = vunpack.i.l.bf16 %v1868_v34  ;;  %v1875_v6 = vunpack.i.h.bf16 %v1873_v5  ;;  %v1874_v8 = vunpack.i.l.bf16 %v1873_v5 }
 0x214   : > { %1649 = vmatprep.subr.msk.bf16.mxu0 %vm2248_vm11, %v1647_v30  ;;  %vm2883_vm2 = vcmp.ge.s32.totalorder %v2172_v40, 2  ;;  %vm2888_vm9 = vcmp.lt.s32.totalorder %v2172_v40, 14  ;;  %v2931_v24 = vmov 0  ;;  %v2934_v30 = vmov 0 }
 0x215   : > { %v736_v43 = vsel %vm2881_vm4, %v1869_v36, %v1870_v35  ;;  %v737_v44 = vsel %vm2881_vm4, %v1870_v35, %v1869_v36  ;;  %1652 = vmatpush1.bf16.msk.msra.mxu0 %vm2261_vm14, %v1650_v33  ;;  %vm2437_vm8 = vmand %vm2884_vm6, %vm2883_vm2  ;;  %v746_v16 = vsel %vm2886_vm3, %v1874_v8, %v1875_v6  ;;  %v747_v19 = vsel %vm2886_vm3, %v1875_v6, %v1874_v8 }
 0x216   : > { %v1653_v45 = vpack.c.bf16 %v737_v44, %v727_v42  ;;  %v1656_v46 = vpack.c.bf16 %v736_v43, %v726_v37  ;;  %vm2928_vm4 = vcmp.lt.s32.totalorder %v2166_v38, 34  ;;  %vm2930_vm6 = vcmp.ge.s32.totalorder %v2175_v41, 2 }
 0x217   : > { %vm2939_vm3 = vcmp.lt.s32.totalorder %v2166_v38, 32  ;;  %vm2970_vm14 = vcmp.lt.s32.totalorder %v2166_v38, 94 }
 0x218   : > { %1655 = vmatprep.subr.msk.bf16.mxu0 %vm2287_vm5, %v1653_v45  ;;  %vm2940_vm2 = vmmov %vm2939_vm3  ;;  %vm2941_vm5 = vcmp.lt.s32.totalorder %v2166_v38, 2 }
 0x219   : > { %1658 = vmatpush1.bf16.msk.msra.mxu0 %vm2295_vm7, %v1656_v46  ;;  %vm2455_vm7 = vmpackc.low %vm2930_vm6, %vm2303_vm0  ;;  %vm2936_vm0 = vcmp.ge.s32.totalorder %v2166_v38, 32  ;;  %v2946_v46 = vmov 0 }
 0x21a   : > { %v2932_v24 = vsel %vm2455_vm7, 4294967295, %v2931_v24  ;;  %vm2473_vm6 = vmand %vm2936_vm0, %vm2888_vm9  ;;  %vm2942_vm0 = vcmp.lt.s32.totalorder %v2166_v38, 30 }
 0x21b   : > { %vm2943_vm9 = vmmov %vm2942_vm0 }
 0x257   : > { %v644_v47 = vpop.f32.mrb[2].mxu0 }
 0x258   : > { %v2376_v48 = vadd.f32 %v644_v47, %v572_v50  ;;  %v646_v49 = vpop.f32.mrb[3].mxu0 }
 0x259   : > { %v2378_v54 = vadd.f32 %v646_v49, %v572_v50 }
 0x25a   : > { %1507 = vst [vmem:[%s2122_s21 + $0x10] sm:$0xff] %v2376_v48  ;;  %v758_v55 = vmul.f32 %v756_v53, %v2376_v48 }
 0x25b   : > { %1508 = vst [vmem:[%s2122_s21 + $0x18] sm:$0xff] %v2378_v54  ;;  %v759_v56 = vmul.f32 %v756_v53, %v2378_v54  ;;  %v1006_v53 = vld [vmem:[%s2862_s4 + $0x18] sm:$0xff] }
 0x25c   : > { %v2386_v58 = vadd.f32 %v764_v51, %v758_v55 }
 0x25d   : > { %v2388_v59 = vadd.f32 %v764_v51, %v759_v56  ;;  %v877_v51 = vld [vmem:[%s2864_s6 + $0x8] sm:$0xff] }
 0x25e   : > { %v768_v60 = vmax.f32 %v2386_v58, 0.0  ;;  %1509 = vmatprep.mubr.msk.f32.mxu0 %vm920_vm13, %v877_v51  ;;  %vm2929_vm13 = vmmov %vm2928_vm4  ;;  %v2950_v51 = vmov 0 }
 0x25f   : > { %v769_v61 = vmax.f32 %v2388_v59, 0.0 }
 0x261   : > { %v1881_v50 = vpack.i.bf16 %v769_v61, %v768_v60 }
 0x263   : > { %1882 = vrot.lane.b32.xlu0 %v1881_v50, %s2035_s9  ;;  %1877 = vrot.lane.b32.xlu1 %v1881_v50, %s2036_s10 }
 0x267   : > { %1892 = vrot.lane.b32.xlu0 %v1881_v50, %s2878_s11  ;;  %1887 = vrot.lane.b32.xlu1 %v1881_v50, %s2876_s12 }
 0x26b   : > { %1902 = vrot.lane.b32.xlu0 %v1881_v50, %s2875_s13  ;;  %1897 = vrot.lane.b32.xlu1 %v1881_v50, %s2877_s14 }
 0x26f   : > { %1912 = vrot.lane.b32.xlu0 %v1881_v50, %s2880_s17  ;;  %1907 = vrot.lane.b32.xlu1 %v1881_v50, %s2879_s18 }
 0x273   : > { %1009 = vperm.xlu0 %1799, %v1006_v53   ;;  %1001 = vperm.xlu1 %1800, %v998_v62  }
 0x277   : > { %1109 = vperm.xlu0 %1799, %v1106_v63   ;;  %1101 = vperm.xlu1 %1800, %v1098_v0  }
 0x27b   : > { %1201 = vperm.xlu0 %1799, %v1198_v1   ;;  %917 = vperm.xlu1 %1800, %v914_v3   ;;  %v2953_v1 = vmov 0 }
 0x27f   : > { %1209 = vperm.xlu1 %1800, %v1206_v4  }
 0x2d5   : > { %v1883_v9 = vpop.permute.xlu0 %1882  ;;  %v1878_v11 = vpop.permute.xlu1 %1877 }
 0x2d6   : > { %v1880_v12 = vunpack.i.h.bf16 %v1878_v11  ;;  %v1879_v13 = vunpack.i.l.bf16 %v1878_v11  ;;  %v1885_v17 = vunpack.i.h.bf16 %v1883_v9  ;;  %v1884_v18 = vunpack.i.l.bf16 %v1883_v9 }
 0x2d8   : > { %v775_v21 = vsel %vm2928_vm4, %v1879_v13, %v1880_v12  ;;  %v776_v22 = vsel %vm2929_vm13, %v1880_v12, %v1879_v13  ;;  %vm2933_vm4 = vcmp.lt.s32.totalorder %v2172_v40, 15  ;;  %v792_v37 = vsel %vm2939_vm3, %v1884_v18, %v1885_v17 }
 0x2d9   : > { %v1659_v25 = vpack.c.bf16 %v775_v21, %v747_v19  ;;  %v1662_v26 = vpack.c.bf16 %v776_v22, %v746_v16  ;;  %v1893_v28 = vpop.permute.xlu0 %1892  ;;  %v1888_v29 = vpop.permute.xlu1 %1887  ;;  %vm2464_vm13 = vmpackc.low %vm2437_vm8, %vm2933_vm4  ;;  %vm2891_vm4 = vcmp.lt.s32.totalorder %v2169_v39, 224  ;;  %v793_v42 = vsel %vm2940_vm2, %v1885_v17, %v1884_v18 }
 0x2da   : > { %v2935_v30 = vsel %vm2464_vm13, 4294967295, %v2934_v30  ;;  %v1895_v32 = vunpack.i.h.bf16 %v1893_v28  ;;  %v1894_v33 = vunpack.i.l.bf16 %v1893_v28  ;;  %v1890_v34 = vunpack.i.h.bf16 %v1888_v29  ;;  %vm2948_vm2 = vmmov %vm2941_vm5 }
 0x2db   : > { %v1889_v35 = vunpack.i.l.bf16 %v1888_v29  ;;  %1661 = vmatprep.subr.msk.bf16.mxu0 %vm2455_vm7, %v1659_v25  ;;  %vm2944_vm3 = vmmov 1   ;;  %vm2945_vm8 = vcmp.lt.s32.totalorder %v2175_v41, 14 }
 0x2dc   : > { %v818_v43 = vsel %vm2941_vm5, %v1894_v33, %v1895_v32  ;;  %1664 = vmatpush1.bf16.msk.msra.mxu0 %vm2464_vm13, %v1662_v26  ;;  %vm2496_vm7 = vmpackc.low %vm2945_vm8, %vm2944_vm3  ;;  %v819_v47 = vsel %vm2948_vm2, %v1895_v32, %v1894_v33  ;;  %vm2952_vm8 = vcmp.ge.s32.totalorder %v2175_v41, 2  ;;  %vm2958_vm5 = vcmp.lt.s32.totalorder %v2166_v38, 98 }
 0x2dd   : > { %v803_v44 = vsel %vm2942_vm0, %v1889_v35, %v1890_v34  ;;  %v804_v45 = vsel %vm2943_vm9, %v1890_v34, %v1889_v35  ;;  %v2947_v46 = vsel %vm2496_vm7, 4294967295, %v2946_v46  ;;  %v1903_v56 = vpop.permute.xlu0 %1902  ;;  %v1898_v50 = vpop.permute.xlu1 %1897  ;;  %vm2949_vm9 = vcmp.ge.s32.totalorder %v2166_v38, 32  ;;  %vm2514_vm2 = vmpackc.low %vm2944_vm3, %vm2952_vm8  ;;  %v876_v34 = vld [vmem:[%s2864_s6] sm:$0xff] }
 0x2de   : > { %v1665_v49 = vpack.c.bf16 %v803_v44, %v792_v37  ;;  %v1668_v55 = vpack.c.bf16 %v804_v45, %v793_v42  ;;  %vm2507_vm0 = vmpackc.low %vm2473_vm6, %vm2949_vm9  ;;  %v1905_v53 = vunpack.i.h.bf16 %v1903_v56  ;;  %v1904_v62 = vunpack.i.l.bf16 %v1903_v56 }
 0x2df   : > { %v2951_v51 = vsel %vm2507_vm0, 4294967295, %v2950_v51  ;;  %v1900_v63 = vunpack.i.h.bf16 %v1898_v50  ;;  %v1899_v0 = vunpack.i.l.bf16 %v1898_v50  ;;  %v2954_v1 = vsel %vm2514_vm2, 4294967295, %v2953_v1  ;;  %vm2955_vm6 = vmmov %vm2952_vm8 }
 0x2e0   : > { %v1671_v3 = vpack.c.bf16 %v769_v61, %v818_v43  ;;  %1667 = vmatprep.subr.msk.bf16.mxu0 %vm2496_vm7, %v1665_v49  ;;  %vm2526_vm9 = vmand %vm2891_vm4, %vm2955_vm6  ;;  %v843_v5 = vsel %vm2958_vm5, %v1905_v53, %v1904_v62  ;;  %vm2959_vm8 = vcmp.lt.s32.totalorder %v2166_v38, 126  ;;  %v1674_v59 = vpack.c.bf16 %v768_v60, %v819_v47 }
 0x2e1   : > { %v832_v6 = vsel %vm2959_vm8, %v1900_v63, %v1899_v0  ;;  %1670 = vmatpush1.bf16.msk.msra.mxu0 %vm2507_vm0, %v1668_v55  ;;  %v1913_v61 = vpop.permute.xlu0 %1912  ;;  %v1908_v8 = vpop.permute.xlu1 %1907  ;;  %vm2960_vm5 = vcmp.ge.s32.totalorder %v2172_v40, 2  ;;  %vm2963_vm8 = vcmp.lt.s32.totalorder %v2175_v41, 14  ;;  %vm2966_vm7 = vcmp.lt.s32.totalorder %v2166_v38, 98 }
 0x2e2   : > { %1673 = vmatprep.subr.msk.bf16.mxu0 %vm2514_vm2, %v1671_v3  ;;  %vm2545_vm4 = vmpackc.low %vm2944_vm3, %vm2960_vm5  ;;  %v1915_v11 = vunpack.i.h.bf16 %v1913_v61  ;;  %v1914_v12 = vunpack.i.l.bf16 %v1913_v61  ;;  %v1910_v58 = vunpack.i.h.bf16 %v1908_v8  ;;  %v1909_v60 = vunpack.i.l.bf16 %v1908_v8 }
 0x2e3   : > { %vm2553_vm6 = vmpackc.low %vm2526_vm9, %vm2963_vm8  ;;  %v842_v14 = vsel %vm2966_vm7, %v1904_v62, %v1905_v53  ;;  %vm2967_vm5 = vcmp.lt.s32.totalorder %v2166_v38, 126  ;;  %v1677_v17 = vpack.c.bf16 %v843_v5, %v832_v6  ;;  %vm2969_vm0 = vcmp.lt.s32.totalorder %v2169_v39, 224 }
 0x2e4   : > { %v831_v16 = vsel %vm2967_vm5, %v1899_v0, %v1900_v63  ;;  %vm2968_vm2 = vmmov %vm2963_vm8  ;;  %v869_v18 = vsel %vm2970_vm14, %v1915_v11, %v1914_v12  ;;  %vm2971_vm9 = vcmp.lt.s32.totalorder %v2166_v38, 96  ;;  %vm2972_vm7 = vcmp.lt.s32.totalorder %v2172_v40, 14 }
 0x2e5   : > { %vm871_vm13 = vmand %vm2969_vm0, %vm2968_vm2  ;;  %v858_v19 = vsel %vm2971_vm9, %v1910_v58, %v1909_v60  ;;  %1676 = vmatpush1.bf16.msk.msra.mxu0 %vm2545_vm4, %v1674_v59  ;;  %vm2973_vm8 = vcmp.ge.s32.totalorder %v2172_v40, 2  ;;  %v1680_v22 = vpack.c.bf16 %v842_v14, %v831_v16  ;;  %vm2979_vm2 = vcmp.lt.s32.totalorder %v2166_v38, 94 }
 0x2e6   : > { %1679 = vmatprep.subr.msk.bf16.mxu0 %vm2553_vm6, %v1677_v17  ;;  %vm2577_vm5 = vmpackc.low %vm2973_vm8, %vm2972_vm7  ;;  %v868_v26 = vsel %vm2979_vm2, %v1914_v12, %v1915_v11  ;;  %v857_v28 = vsel %vm2971_vm9, %v1909_v60, %v1910_v58  ;;  %v1683_v29 = vpack.c.bf16 %v869_v18, %v858_v19  ;;  %vm2988_vm8 = vcmp.lt.s32.totalorder %v2166_v38, 17 }
 0x2e7   : > { %vm2976_vm14 = vmmov %vm2969_vm0  ;;  %v1686_v33 = vpack.c.bf16 %v868_v26, %v857_v28 }
 0x2e8   : > { %vm2583_vm0 = vmpackc.low %vm871_vm13, %vm2976_vm14  ;;  %vm2989_vm14 = vcmp.lt.s32.totalorder %v2166_v38, 16 }
 0x2e9   : > { %1682 = vmatpush1.bf16.msk.msra.mxu0 %vm2577_vm5, %v1680_v22  ;;  %vm2598_vm13 = vmpackc.low %vm2972_vm7, %vm2944_vm3  ;;  %vm2992_vm7 = vcmp.lt.s32.totalorder %v2166_v38, 15 }
 0x2ea   : > { %1685 = vmatprep.subr.msk.bf16.mxu0 %vm2583_vm0, %v1683_v29  ;;  %vm2990_vm2 = vmmov %vm2988_vm8 }
 0x2eb   : > { %vm2991_vm9 = vmmov %vm2989_vm14 }
 0x2ed   : > { %1688 = vmatpush1.bf16.msk.msra.mxu0 %vm2598_vm13, %v1686_v33 }
 0x2f0   : > { %989 = vmatmul.mubr.f32.vlgmr.msra.gmra.mrb[4].mxu0 %v876_v34 }
 0x2f2   : > { %v1002_v35 = vpop.permute.xlu1 %1001  ;;  %v1010_v42 = vpop.permute.xlu0 %1009 }
 0x2f3   : > { %v1004_v36 = vmul.f32 %v1002_v35, %v2124_v20  ;;  %v1005_v37 = vmul.f32 %v1002_v35, %v2126_v23 }
 0x2f5   : > { %v2609_v43 = vadd.f32 %v1010_v42, %v1004_v36  ;;  %v2611_v44 = vadd.f32 %v1010_v42, %v1005_v37 }
 0x2f6   : > { %v1102_v55 = vpop.permute.xlu1 %1101  ;;  %v1110_v56 = vpop.permute.xlu0 %1109 }
 0x2f7   : > { %v1014_v45 = vmax.f32 %v2609_v43, 0.0  ;;  %v1015_v47 = vmax.f32 %v2611_v44, 0.0  ;;  %v1104_v20 = vmul.f32 %v1102_v55, %v2376_v48  ;;  %v1105_v23 = vmul.f32 %v1102_v55, %v2378_v54 }
 0x2f9   : > { %v1921_v49 = vpack.i.bf16 %v1015_v47, %v1014_v45  ;;  %v2625_v50 = vadd.f32 %v1110_v56, %v1104_v20  ;;  %v2627_v53 = vadd.f32 %v1110_v56, %v1105_v23 }
 0x2fa   : > { %v2647_v54 = vpop.permute.xlu1 %917  ;;  %v2649_v0 = vpop.permute.xlu0 %1201 }
 0x2fb   : > { %1922 = vrot.lane.b32.xlu1 %v1921_v49, %s2026_s22  ;;  %1917 = vrot.lane.b32.xlu0 %v1921_v49, %s2027_s23  ;;  %v1114_v62 = vmax.f32 %v2625_v50, 0.0  ;;  %v1115_v63 = vmax.f32 %v2627_v53, 0.0  ;;  %s2982_s22 = smov 2   ;;  %s2983_s23 = smov 30  }
 0x2fd   : > { %v1961_v48 = vpack.i.bf16 %v1115_v63, %v1114_v62 }
 0x2fe   : > { %v2651_v3 = vpop.permute.xlu1 %1209 }
 0x2ff   : > { %1932 = vrot.lane.b32.xlu1 %v1921_v49, %s2028_s24  ;;  %1927 = vrot.lane.b32.xlu0 %v1921_v49, %s2029_s25  ;;  %s2984_s24 = smov 98   ;;  %s2985_s25 = smov 126  }
 0x303   : > { %1942 = vrot.lane.b32.xlu1 %v1921_v49, %s2030_s26  ;;  %1937 = vrot.lane.b32.xlu0 %v1921_v49, %s2031_s28  ;;  %s2986_s26 = smov 94   ;;  %s2987_s28 = smov 96  }
 0x307   : > { %1952 = vrot.lane.b32.xlu1 %v1921_v49, %s2032_s29  ;;  %1947 = vrot.lane.b32.xlu0 %v1921_v49, %s2033_s30  ;;  %s2043_s29 = smov 60   ;;  %s2044_s30 = smov 64  }
 0x30b   : > { %1962 = vrot.lane.b32.xlu1 %v1961_v48, %s2035_s9  ;;  %1957 = vrot.lane.b32.xlu0 %v1961_v48, %s2036_s10  ;;  %s2045_s9 = smov 68   ;;  %s2046_s10 = smov 4  }
 0x30f   : > { %1972 = vrot.lane.b32.xlu1 %v1961_v48, %s2982_s22  ;;  %1967 = vrot.lane.b32.xlu0 %v1961_v48, %s2983_s23 }
 0x313   : > { %1982 = vrot.lane.b32.xlu1 %v1961_v48, %s2984_s24  ;;  %1977 = vrot.lane.b32.xlu0 %v1961_v48, %s2985_s25 }
 0x317   : > { %1992 = vrot.lane.b32.xlu1 %v1961_v48, %s2986_s26  ;;  %1987 = vrot.lane.b32.xlu0 %v1961_v48, %s2987_s28 }
 0x36d   : > { %v1918_v4 = vpop.permute.xlu0 %1917  ;;  %v1923_v5 = vpop.permute.xlu1 %1922 }
 0x36e   : > { %v1920_v6 = vunpack.i.h.bf16 %v1918_v4  ;;  %v1919_v59 = vunpack.i.l.bf16 %v1918_v4  ;;  %v1925_v61 = vunpack.i.h.bf16 %v1923_v5  ;;  %v1924_v8 = vunpack.i.l.bf16 %v1923_v5 }
 0x370   : > { %v1020_v11 = vsel %vm2988_vm8, %v1919_v59, %v1920_v6  ;;  %v1030_v12 = vsel %vm2989_vm14, %v1924_v8, %v1925_v61  ;;  %v1021_v58 = vsel %vm2990_vm2, %v1920_v6, %v1919_v59  ;;  %v1031_v60 = vsel %vm2991_vm9, %v1925_v61, %v1924_v8  ;;  %vm2993_vm8 = vmmov %vm2992_vm7 }
 0x371   : > { %v1928_v14 = vpop.permute.xlu0 %1927  ;;  %v1933_v16 = vpop.permute.xlu1 %1932  ;;  %v1689_v17 = vpack.c.bf16 %v1030_v12, %v1020_v11  ;;  %v1692_v18 = vpack.c.bf16 %v1031_v60, %v1021_v58  ;;  %vm2994_vm14 = vcmp.lt.s32.totalorder %v2166_v38, 1 }
 0x372   : > { %v1930_v19 = vunpack.i.h.bf16 %v1928_v14  ;;  %v1929_v22 = vunpack.i.l.bf16 %v1928_v14  ;;  %v1935_v26 = vunpack.i.h.bf16 %v1933_v16  ;;  %v1934_v28 = vunpack.i.l.bf16 %v1933_v16  ;;  %vm2995_vm2 = vmmov %vm2994_vm14 }
 0x373   : > { %1691 = vmatprep.subr.msk.bf16.mxu1 %vm2199_vm10, %v1689_v17  ;;  %vm2996_vm10 = vcmp.lt.s32.totalorder %v2166_v38, 127 }
 0x374   : > { %v1040_v29 = vsel %vm2992_vm7, %v1929_v22, %v1930_v19  ;;  %v1041_v33 = vsel %vm2993_vm8, %v1930_v19, %v1929_v22  ;;  %v1050_v34 = vsel %vm2994_vm14, %v1934_v28, %v1935_v26  ;;  %v1051_v35 = vsel %vm2995_vm2, %v1935_v26, %v1934_v28  ;;  %1694 = vmatpush1.bf16.msk.msra.mxu1 %vm2206_vm12, %v1692_v18  ;;  %vm2997_vm9 = vmmov %vm2996_vm10 }
 0x375   : > { %v1695_v36 = vpack.c.bf16 %v1050_v34, %v1040_v29  ;;  %v1698_v37 = vpack.c.bf16 %v1051_v35, %v1041_v33  ;;  %v1938_v42 = vpop.permute.xlu0 %1937  ;;  %v1943_v52 = vpop.permute.xlu1 %1942  ;;  %vm2998_vm12 = vcmp.lt.s32.totalorder %v2166_v38, 113  ;;  %vm3002_vm8 = vnez %v2907_v15 }
 0x376   : > { %v1940_v49 = vunpack.i.h.bf16 %v1938_v42  ;;  %v1939_v55 = vunpack.i.l.bf16 %v1938_v42  ;;  %v1945_v20 = vunpack.i.h.bf16 %v1943_v52  ;;  %v1944_v23 = vunpack.i.l.bf16 %v1943_v52 }
 0x377   : > { %1697 = vmatprep.subr.msk.bf16.mxu1 %vm2231_vm15, %v1695_v36  ;;  %vm2999_vm15 = vmmov %vm2998_vm12  ;;  %vm3004_vm14 = vcmp.lt.s32.totalorder %v2166_v38, 111 }
 0x378   : > { %v1062_v56 = vsel %vm2996_vm10, %v1939_v55, %v1940_v49  ;;  %v1063_v48 = vsel %vm2997_vm9, %v1940_v49, %v1939_v55  ;;  %1700 = vmatpush1.bf16.msk.msra.mxu1 %vm2238_vm1, %v1698_v37  ;;  %v1072_v61 = vsel %vm2998_vm12, %v1944_v23, %v1945_v20  ;;  %v1073_v8 = vsel %vm2999_vm15, %v1945_v20, %v1944_v23  ;;  %vm3005_vm2 = vmmov %vm3004_vm14 }
 0x379   : > { %v1701_v57 = vpack.c.bf16 %v1063_v48, %v1015_v47  ;;  %v1704_v4 = vpack.c.bf16 %v1062_v56, %v1014_v45  ;;  %v1948_v5 = vpop.permute.xlu0 %1947  ;;  %v1953_v6 = vpop.permute.xlu1 %1952  ;;  %vm3000_vm1 = vcmp.lt.s32.totalorder %v2166_v38, 112  ;;  %vm3006_vm10 = vcmp.lt.s32.totalorder %v2166_v38, 34 }
 0x37a   : > { %v1950_v59 = vunpack.i.h.bf16 %v1948_v5  ;;  %v1949_v2 = vunpack.i.l.bf16 %v1948_v5  ;;  %vm3001_vm7 = vmmov %vm3000_vm1  ;;  %v1955_v44 = vunpack.i.h.bf16 %v1953_v6  ;;  %v1954_v45 = vunpack.i.l.bf16 %v1953_v6 }
 0x37b   : > { %1703 = vmatprep.subr.msk.bf16.mxu1 %vm2248_vm11, %v1701_v57  ;;  %vm3003_vm11 = vnez %v2909_v27  ;;  %vm3007_vm9 = vmmov %vm3006_vm10  ;;  %vm3008_vm12 = vnez %v2911_v31  ;;  %vm3009_vm15 = vcmp.lt.s32.totalorder %v2166_v38, 32 }
 0x37c   : > { %v1082_v7 = vsel %vm3000_vm1, %v1949_v2, %v1950_v59  ;;  %v1083_v43 = vsel %vm3001_vm7, %v1950_v59, %v1949_v2  ;;  %1706 = vmatpush1.bf16.msk.msra.mxu1 %vm3002_vm8, %v1704_v4  ;;  %v1092_v17 = vsel %vm3004_vm14, %v1954_v45, %v1955_v44  ;;  %v1093_v18 = vsel %vm3005_vm2, %v1955_v44, %v1954_v45  ;;  %vm3011_vm7 = vmmov %vm3009_vm15 }
 0x37d   : > { %v1707_v47 = vpack.c.bf16 %v1083_v43, %v1073_v8  ;;  %v1710_v11 = vpack.c.bf16 %v1082_v7, %v1072_v61  ;;  %v1958_v12 = vpop.permute.xlu0 %1957  ;;  %v1963_v58 = vpop.permute.xlu1 %1962  ;;  %vm3010_vm1 = vnez %v2932_v24  ;;  %vm3012_vm8 = vcmp.lt.s32.totalorder %v2166_v38, 30 }
 0x37e   : > { %v1960_v60 = vunpack.i.h.bf16 %v1958_v12  ;;  %v1959_v14 = vunpack.i.l.bf16 %v1958_v12  ;;  %v1965_v16 = vunpack.i.h.bf16 %v1963_v58  ;;  %v1964_v10 = vunpack.i.l.bf16 %v1963_v58 }
 0x37f   : > { %1709 = vmatprep.subr.msk.bf16.mxu1 %vm3003_vm11, %v1707_v47  ;;  %vm3013_vm11 = vmmov %vm3012_vm8  ;;  %vm3014_vm14 = vcmp.lt.s32.totalorder %v2166_v38, 2  ;;  %vm3015_vm2 = vnez %v2935_v30 }
 0x380   : > { %v1120_v15 = vsel %vm3006_vm10, %v1959_v14, %v1960_v60  ;;  %v1121_v19 = vsel %vm3007_vm9, %v1960_v60, %v1959_v14  ;;  %1712 = vmatpush1.bf16.msk.msra.mxu1 %vm3008_vm12, %v1710_v11  ;;  %v1130_v36 = vsel %vm3009_vm15, %v1964_v10, %v1965_v16  ;;  %v1131_v37 = vsel %vm3011_vm7, %v1965_v16, %v1964_v10  ;;  %vm3016_vm10 = vmmov %vm3014_vm14 }
 0x381   : > { %v1713_v22 = vpack.c.bf16 %v1120_v15, %v1093_v18  ;;  %v1716_v26 = vpack.c.bf16 %v1121_v19, %v1092_v17  ;;  %v1968_v28 = vpop.permute.xlu0 %1967  ;;  %v1973_v27 = vpop.permute.xlu1 %1972  ;;  %vm3017_vm9 = vnez %v2947_v46  ;;  %vm3018_vm12 = vcmp.lt.s32.totalorder %v2166_v38, 126 }
 0x382   : > { %v1970_v29 = vunpack.i.h.bf16 %v1968_v28  ;;  %v1969_v33 = vunpack.i.l.bf16 %v1968_v28  ;;  %v1975_v34 = vunpack.i.h.bf16 %v1973_v27  ;;  %v1974_v35 = vunpack.i.l.bf16 %v1973_v27 }
 0x383   : > { %1715 = vmatprep.subr.msk.bf16.mxu1 %vm3010_vm1, %v1713_v22  ;;  %vm3019_vm15 = vcmp.lt.s32.totalorder %v2166_v38, 98  ;;  %vm3020_vm1 = vnez %v2951_v51  ;;  %vm3021_vm7 = vnez %v2954_v1 }
 0x384   : > { %v1140_v31 = vsel %vm3012_vm8, %v1969_v33, %v1970_v29  ;;  %v1141_v42 = vsel %vm3013_vm11, %v1970_v29, %v1969_v33  ;;  %v1150_v52 = vsel %vm3014_vm14, %v1974_v35, %v1975_v34  ;;  %1718 = vmatpush1.bf16.msk.msra.mxu1 %vm3015_vm2, %v1716_v26  ;;  %v1151_v24 = vsel %vm3016_vm10, %v1975_v34, %v1974_v35  ;;  %vm3022_vm8 = vmmov %vm3018_vm12 }
 0x385   : > { %v1719_v49 = vpack.c.bf16 %v1140_v31, %v1130_v36  ;;  %v1722_v55 = vpack.c.bf16 %v1141_v42, %v1131_v37  ;;  %v1978_v20 = vpop.permute.xlu0 %1977  ;;  %v1983_v23 = vpop.permute.xlu1 %1982  ;;  %v1725_v5 = vpack.c.bf16 %v1115_v63, %v1150_v52  ;;  %v1728_v59 = vpack.c.bf16 %v1114_v62, %v1151_v24  ;;  %vm3023_vm11 = vmmov %vm3019_vm15 }
 0x386   : > { %v1980_v56 = vunpack.i.h.bf16 %v1978_v20  ;;  %v1979_v48 = vunpack.i.l.bf16 %v1978_v20  ;;  %v1985_v57 = vunpack.i.h.bf16 %v1983_v23  ;;  %v1984_v4 = vunpack.i.l.bf16 %v1983_v23 }
 0x387   : > { %1721 = vmatprep.subr.msk.bf16.mxu1 %vm3017_vm9, %v1719_v49  ;;  %vm3024_vm14 = vcmp.lt.s32.totalorder %v2166_v38, 96  ;;  %vm3025_vm2 = vcmp.lt.s32.totalorder %v2166_v38, 94 }
 0x388   : > { %v1163_v30 = vsel %vm3018_vm12, %v1980_v56, %v1979_v48  ;;  %v1173_v6 = vsel %vm3019_vm15, %v1985_v57, %v1984_v4  ;;  %1724 = vmatpush1.bf16.msk.msra.mxu1 %vm3020_vm1, %v1722_v55  ;;  %v1162_v7 = vsel %vm3022_vm8, %v1979_v48, %v1980_v56  ;;  %v1172_v43 = vsel %vm3023_vm11, %v1984_v4, %v1985_v57  ;;  %vm3026_vm10 = vmmov %vm3024_vm14 }
 0x389   : > { %v1988_v2 = vpop.permute.xlu0 %1987  ;;  %v1993_v61 = vpop.permute.xlu1 %1992  ;;  %1727 = vmatprep.subr.msk.bf16.mxu1 %vm3021_vm7, %v1725_v5  ;;  %v1731_v51 = vpack.c.bf16 %v1173_v6, %v1163_v30  ;;  %v1734_v1 = vpack.c.bf16 %v1172_v43, %v1162_v7  ;;  %vm3027_vm9 = vmmov %vm3025_vm2  ;;  %vm1226_vm12 = vcmp.ge.s32.totalorder %v2175_v41, 4  ;;  %vm1251_vm1 = vcmp.lt.s32.totalorder %v2172_v40, 12 }
 0x38a   : > { %v1990_v53 = vunpack.i.h.bf16 %v1988_v2  ;;  %v1989_v46 = vunpack.i.l.bf16 %v1988_v2  ;;  %v1995_v63 = vunpack.i.h.bf16 %v1993_v61  ;;  %v1994_v8 = vunpack.i.l.bf16 %v1993_v61  ;;  %vm1744_vm8 = vmpackc.low %vm2944_vm3, %vm1226_vm12 }
 0x38b   : > { %vm1248_vm7 = vcmp.lt.s32.totalorder %v2166_v38, 60  ;;  %vm1263_vm11 = vcmp.lt.s32.totalorder %v2166_v38, 4 }
 0x38c   : > { %v1183_v50 = vsel %vm3024_vm14, %v1990_v53, %v1989_v46  ;;  %v1193_v62 = vsel %vm3025_vm2, %v1995_v63, %v1994_v8  ;;  %1730 = vmatpush1.bf16.msk.msra.mxu1 %vm2545_vm4, %v1728_v59  ;;  %v1182_v44 = vsel %vm3026_vm10, %v1989_v46, %v1990_v53  ;;  %v1192_v45 = vsel %vm3027_vm9, %v1994_v8, %v1995_v63 }
 0x38d   : > { %1733 = vmatprep.subr.msk.bf16.mxu1 %vm2553_vm6, %v1731_v51  ;;  %v1737_v47 = vpack.c.bf16 %v1193_v62, %v1183_v50  ;;  %v1740_v9 = vpack.c.bf16 %v1192_v45, %v1182_v44  ;;  %vm1363_vm4 = vcmask 719872   ;;  %vm1223_vm6 = vcmp.ge.s32.totalorder %v2166_v38, 64 }
 0x38e   : > { %vm1252_vm2 = vcmp.lt.s32.totalorder %v2175_v41, 12  ;;  %vm2805_vm10 = vmand %vm1223_vm6, %vm1251_vm1  ;;  %vm1276_vm9 = vcmp.lt.s32.totalorder %v2166_v38, 124 }
 0x390   : > { %1736 = vmatpush1.bf16.msk.msra.mxu1 %vm2577_vm5, %v1734_v1  ;;  %vm1225_vm5 = vcmp.ge.s32.totalorder %v2172_v40, 4 }
 0x391   : > { %1739 = vmatprep.subr.msk.bf16.mxu1 %vm2583_vm0, %v1737_v47  ;;  %vm1237_vm0 = vcmp.lt.s32.totalorder %v2166_v38, 64  ;;  %vm1227_vm15 = vmand %vm1223_vm6, %vm1225_vm5 }
 0x392   : > { %vm1747_vm14 = vmpackc.low %vm1223_vm6, %vm1227_vm15 }
 0x393   : > { %vm1750_vm6 = vmpackc.low %vm1226_vm12, %vm1252_vm2 }
 0x394   : > { %1742 = vmatpush1.bf16.msk.msra.mxu1 %vm2598_vm13, %v1740_v9  ;;  %vm1220_vm13 = vcmp.lt.s32.totalorder %v2166_v38, 68  ;;  %v1301_v38 = vld [vmem:[%s2865_s7] sm:$0xff] }
 0x3c3   : > { %v990_v13 = vpop.f32.mrb[4].mxu0 }
 0x3c4   : > { %v991_v11 = vadd.f32 %v990_v13, %v2647_v54  ;;  %v992_v12 = vpop.f32.mrb[5].mxu0 }
 0x3c5   : > { %v993_v58 = vadd.f32 %v992_v12, %v2647_v54 }
 0x3c6   : > { %1510 = vst [vmem:[%s2122_s21 + $0x20] sm:$0xff] %v991_v11  ;;  %v1204_v60 = vmul.f32 %v2649_v0, %v991_v11 }
 0x3c7   : > { %1511 = vst [vmem:[%s2122_s21 + $0x28] sm:$0xff] %v993_v58  ;;  %v1205_v21 = vmul.f32 %v2649_v0, %v993_v58  ;;  %v1357_v0 = vld [vmem:[%s2860_s2 + $0x18] sm:$0xff] }
 0x3c8   : > { %v1212_v14 = vadd.f32 %v2651_v3, %v1204_v60 }
 0x3c9   : > { %v1213_v25 = vadd.f32 %v2651_v3, %v1205_v21  ;;  %v1302_v3 = vld [vmem:[%s2865_s7 + $0x8] sm:$0xff] }
 0x3ca   : > { %v2769_v16 = vmax.f32 %v1212_v14, 0.0  ;;  %1512 = vmatprep.mubr.msk.f32.mxu1 %vm1363_vm4, %v1302_v3  ;;  %vm1284_vm4 = vcmp.lt.s32.totalorder %v2169_v39, 192 }
 0x3cb   : > { %v2771_v32 = vmax.f32 %v1213_v25, 0.0  ;;  %vm1286_vm15 = vmand %vm1284_vm4, %vm1226_vm12 }
 0x3cc   : > { %1244 = vrot.lane.b32.xlu0 %v2769_v16, %s2043_s29  ;;  %vm1765_vm12 = vmpackc.low %vm2944_vm3, %vm1225_vm5 }
 0x3cd   : > { %v2001_v54 = vpack.i.bf16 %v2771_v32, %v2769_v16 }
 0x3cf   : > { %2002 = vrot.lane.b32.xlu1 %v2001_v54, %s2044_s30 }
 0x3d0   : > { %1997 = vrot.lane.b32.xlu0 %v2001_v54, %s2045_s9 }
 0x3d3   : > { %1246 = vrot.lane.b32.xlu1 %v2771_v32, %s2043_s29 }
 0x3d4   : > { %2007 = vrot.lane.b32.xlu0 %v2001_v54, %s2046_s10 }
 0x3d7   : > { %2012 = vrot.lane.b32.xlu1 %v2001_v54, %s2047_s15 }
 0x3d8   : > { %1360 = vperm.xlu0 %1799, %v1357_v0  }
 0x43e   : > { %v1245_v10 = vpop.permute.xlu0 %1244 }
 0x441   : > { %v2003_v17 = vpop.permute.xlu1 %2002 }
 0x442   : > { %v2005_v18 = vunpack.i.h.bf16 %v2003_v17  ;;  %v2004_v15 = vunpack.i.l.bf16 %v2003_v17  ;;  %v1998_v19 = vpop.permute.xlu0 %1997 }
 0x443   : > { %v2000_v22 = vunpack.i.h.bf16 %v1998_v19  ;;  %v1999_v26 = vunpack.i.l.bf16 %v1998_v19 }
 0x444   : > { %v1238_v28 = vsel %vm1237_vm0, %v2004_v15, %v2005_v18  ;;  %v1239_v27 = vsel %vm1237_vm0, %v2005_v18, %v2004_v15  ;;  %vm1753_vm0 = vmpackc.low %vm1225_vm5, %vm2805_vm10 }
 0x445   : > { %v1221_v29 = vsel %vm1220_vm13, %v1999_v26, %v2000_v22  ;;  %v1222_v33 = vsel %vm1220_vm13, %v2000_v22, %v1999_v26  ;;  %v1247_v34 = vpop.permute.xlu1 %1246  ;;  %vm1756_vm13 = vmpackc.low %vm1252_vm2, %vm2944_vm3 }
 0x446   : > { %v1743_v35 = vpack.c.bf16 %v1238_v28, %v1221_v29  ;;  %v1746_v36 = vpack.c.bf16 %v1239_v27, %v1222_v33  ;;  %v2008_v37 = vpop.permute.xlu0 %2007  ;;  %v1249_v49 = vsel %vm1248_vm7, %v1245_v10, %v1247_v34  ;;  %v1250_v55 = vsel %vm1248_vm7, %v1247_v34, %v1245_v10  ;;  %vm1759_vm7 = vmpackc.low %vm1251_vm1, %vm2944_vm3 }
 0x447   : > { %v2010_v31 = vunpack.i.h.bf16 %v2008_v37  ;;  %v2009_v42 = vunpack.i.l.bf16 %v2008_v37 }
 0x448   : > { %1745 = vmatprep.subr.msk.bf16.mxu1 %vm1744_vm8, %v1743_v35  ;;  %vm1762_vm8 = vmpackc.low %vm1284_vm4, %vm1286_vm15 }
 0x449   : > { %v1264_v24 = vsel %vm1263_vm11, %v2009_v42, %v2010_v31  ;;  %v1265_v20 = vsel %vm1263_vm11, %v2010_v31, %v2009_v42  ;;  %v2013_v23 = vpop.permute.xlu1 %2012  ;;  %1748 = vmatpush1.bf16.msk.msra.mxu1 %vm1747_vm14, %v1746_v36  ;;  %vm1296_vm11 = vmand %vm1284_vm4, %vm1252_vm2 }
 0x44a   : > { %v1749_v56 = vpack.c.bf16 %v1264_v24, %v1249_v49  ;;  %v1752_v48 = vpack.c.bf16 %v1265_v20, %v1250_v55  ;;  %v2015_v57 = vunpack.i.h.bf16 %v2013_v23  ;;  %v2014_v4 = vunpack.i.l.bf16 %v2013_v23 }
 0x44c   : > { %v1277_v5 = vsel %vm1276_vm9, %v2014_v4, %v2015_v57  ;;  %v1278_v30 = vsel %vm1276_vm9, %v2015_v57, %v2014_v4  ;;  %1751 = vmatprep.subr.msk.bf16.mxu1 %vm1750_vm6, %v1749_v56 }
 0x44d   : > { %v1755_v6 = vpack.c.bf16 %v1278_v30, %v2771_v32  ;;  %1754 = vmatpush1.bf16.msk.msra.mxu1 %vm1753_vm0, %v1752_v48  ;;  %v1758_v59 = vpack.c.bf16 %v1277_v5, %v2769_v16 }
 0x44f   : > { %1757 = vmatprep.subr.msk.bf16.mxu1 %vm1756_vm13, %v1755_v6 }
 0x451   : > { %1760 = vmatpush1.bf16.msk.msra.mxu1 %vm1759_vm7, %v1758_v59 }
 0x452   : > { %1763 = vmatprep.subr.msk.bf16.mxu1 %vm1762_vm8, %v1746_v36 }
 0x455   : > { %1766 = vmatpush1.bf16.msk.msra.mxu1 %vm1765_vm12, %v1743_v35 }
 0x456   : > { %1601 = vmatprep.subr.msk.mxu1 %vm1296_vm11, %v1250_v55 }
 0x457   : > { %v1361_v2 = vpop.permute.xlu0 %1360 }
 0x459   : > { %1602 = vmatpush1.msk.msra.mxu1 %vm1251_vm1, %v1249_v49 }
 0x45a   : > { %1432 = vmatmul.mubr.f32.vlgmr.msra.gmra.mrb[0].mxu1 %v1301_v38 }
 0x52d   : > { %v1433_v61 = vpop.f32.mrb[0].mxu1 }
 0x52e   : > { %v1434_v53 = vadd.f32 %v1433_v61, %v1361_v2  ;;  %v1435_v46 = vpop.f32.mrb[1].mxu1 }
 0x52f   : > { %v1436_v63 = vadd.f32 %v1435_v46, %v1361_v2 }
 0x530   : > { %1513 = vst [vmem:[%s2122_s21 + $0x30] sm:$0xff] %v1434_v53 }
 0x531   : > { %1514 = vst [vmem:[%s2122_s21 + $0x38] sm:$0xff] %v1436_v63 }
 0x532 PF: > { %s18_s27 = sadd.s32 1, %s2022_s27  }
 0x533   : > { %p15_p4 = scmp.ge.s32.totalorder %s18_s27, 4  }
 0x535   :  { %17 = sbr.rel (!%p15_p4) target bundleno = 1 (0x1), region = 85 }

</bundles_post_ra>
